<compile_context>
chip_gen: v5e
topology: v5e:2x2
jax: 0.10.0
libtpu: 0.0.40
codegen_flags: <defaults>
</compile_context>

<pallas_src>
import functools

import jax
import jax.numpy as jnp
from jax import lax
from jax.experimental import pallas as pl
from jax.experimental.pallas import tpu as pltpu

EPS = 1e-5  # matches torch var(+1e-5) and RevIN eps


def _round_up(a, b):
    return (a + b - 1) // b * b


# ----------------------------------------------------------------------------
# Fused forward kernel: one grid step == one batch chunk of Bt elements.
#   x_sc : (S, Bt*E)     col = b*E + e   (stats / decomp / trend path)
#   x_fb : (S*E, Bt)     row = t*E + e   (projector path, conv folded in W1)
# ----------------------------------------------------------------------------
def _fused_kernel(S, E, Bt,
                  x_sc_ref, x_fb_ref,
                  wp1m_ref, wp1s_ref, bp1_ref, wp2_ref, bp2_ref, wp3_ref,
                  ama_ref, rv_ref,
                  tw1_ref, tb1_ref, tw2_ref, tb2_ref, tw3_ref, tb3_ref,
                  dec_ref, td_ref):
    f32 = jnp.float32
    x = x_sc_ref[...]                                       # (S, C), C = Bt*E

    # ---- instance statistics over time (torch var unbiased=False) ----------
    mean = jnp.mean(x, axis=0, keepdims=True)               # (1, C)
    xc = x - mean
    var_eps = jnp.mean(xc * xc, axis=0, keepdims=True) + EPS
    inv_std = lax.rsqrt(var_eps)                            # EUP, no divide
    std = var_eps * inv_std                                 # == sqrt(var+eps)
    x_norm = xc * inv_std

    # ---- tau / delta Projector ---------------------------------------------
    # Same stats recomputed directly in (E, Bt) layout from the flat view
    # (cheap; avoids a lane<->sublane relayout of the (1, C) stats).
    xf = x_fb_ref[...]                                      # (S*E, Bt)
    x3 = xf.reshape(S, E, Bt)
    mean_eb = jnp.mean(x3, axis=0)                          # (E, Bt)
    xc3 = x3 - mean_eb
    var_eb = jnp.mean(xc3 * xc3, axis=0) + EPS
    std_eb = var_eb * lax.rsqrt(var_eb)                     # (E, Bt)
    stats_eb = jnp.concatenate([std_eb, mean_eb], axis=0)   # (2E, Bt): std|mean

    # layer 1: circular conv folded into wp1m at pack time -> one big GEMM
    h = jnp.dot(wp1m_ref[...], xf, preferred_element_type=f32)          # (2H0, Bt)
    h = h + jnp.dot(wp1s_ref[...], stats_eb, preferred_element_type=f32)
    h = jnp.maximum(h + bp1_ref[...], 0.0)
    h = jnp.maximum(jnp.dot(wp2_ref[...], h, preferred_element_type=f32)
                    + bp2_ref[...], 0.0)                                 # (2H1, Bt)
    td = jnp.dot(wp3_ref[...], h, preferred_element_type=f32)           # (S+1, Bt)
    td_ref[:S, :] = td[:S, :]                               # delta rows
    td_ref[S:, :] = jnp.exp(td[S:, :])                      # exp only on tau row

    # ---- series_decomp (moving average as a (S,S) matmul) ------------------
    trend = jnp.dot(ama_ref[...], x_norm, preferred_element_type=f32)   # (S, C)
    # TODO(synk): seasonal branch (x_norm - trend -> Fourier attention enc/dec)
    # is undefined in the provided source and omitted here.

    # ---- RevIN norm -> trend MLP -> RevIN denorm ---------------------------
    r_mean = jnp.mean(trend, axis=0, keepdims=True)
    tc = trend - r_mean
    r_var_eps = jnp.mean(tc * tc, axis=0, keepdims=True) + EPS
    inv_r_std = lax.rsqrt(r_var_eps)
    r_std = r_var_eps * inv_r_std
    rw = rv_ref[0:1, :]                                     # tiled RevIN weight
    rb = rv_ref[1:2, :]                                     # tiled RevIN bias
    rw_inv = rv_ref[2:3, :]                                 # tiled 1/(w+eps^2)
    tn = (tc * inv_r_std) * rw + rb                         # RevIN 'norm'

    ht = jnp.maximum(jnp.dot(tw1_ref[...], tn, preferred_element_type=f32)
                     + tb1_ref[...], 0.0)                   # (D, C)
    ht = jnp.maximum(jnp.dot(tw2_ref[...], ht, preferred_element_type=f32)
                     + tb2_ref[...], 0.0)                   # (D, C)
    out = jnp.dot(tw3_ref[...], ht, preferred_element_type=f32) + tb3_ref[...]  # (P, C)

    out = (out - rb) * rw_inv                               # RevIN 'denorm'
    out = out * r_std + r_mean
    dec_ref[...] = out * std + mean                         # final de-normalization


def fused_forward(x, p, cfg):
    """x: (B, S, E) -> (dec_out (B, P, E), tau (B, 1), delta (B, S))."""
    B, S, E = x.shape
    P = cfg["pred_len"]
    D = cfg["d_model"]
    H0, H1 = cfg["p_hidden_dims"]

    # Batch-chunk size: Bt*E is always a multiple of 128 (lane-dense blocks).
    # Small B -> a single chunk; large B -> 128-wide chunks so v7x can split
    # the grid across both TensorCores.
    unit = (128 // E) if 128 % E == 0 else 128
    Bt = 128 if B > 128 else _round_up(B, unit)
    Bp = _round_up(B, Bt)
    C = Bt * E
    n_chunks = Bp // Bt

    xp = jnp.pad(x.astype(jnp.float32), ((0, Bp - B), (0, 0), (0, 0)))
    x_sc = xp.transpose(1, 0, 2).reshape(S, Bp * E)          # [t, b*E + e]
    x_fb = xp.reshape(Bp, S * E).T                           # [t*E + e, b]
    rv = jnp.tile(p["revin3"], (1, Bt))                      # (3, C), period E

    def wspec(shape):
        return pl.BlockSpec(shape, lambda i: (0, 0))

    in_specs = [
        pl.BlockSpec((S, C), lambda i: (0, i)),              # x_sc chunk
        pl.BlockSpec((S * E, Bt), lambda i: (0, i)),         # x_fb chunk
        wspec((2 * H0, S * E)),                              # wp1m (conv folded)
        wspec((2 * H0, 2 * E)),                              # wp1s (std|mean)
        wspec((2 * H0, 1)),                                  # bp1
        wspec((2 * H1, 2 * H0)),                             # wp2 (block diag)
        wspec((2 * H1, 1)),                                  # bp2
        wspec((S + 1, 2 * H1)),                              # wp3 (delta|tau rows)
        wspec((S, S)),                                       # moving-average matrix
        wspec((3, C)),                                       # tiled RevIN params
        wspec((D, S)), wspec((D, 1)),                        # trend layer 1
        wspec((D, D)), wspec((D, 1)),                        # trend layer 2
        wspec((P, D)), wspec((P, 1)),                        # trend layer 3
    ]
    out_specs = [
        pl.BlockSpec((P, C), lambda i: (0, i)),              # dec slab (lane-dense)
        pl.BlockSpec((S + 1, Bt), lambda i: (0, i)),         # [delta rows | tau row]
    ]
    out_shape = (
        jax.ShapeDtypeStruct((P, Bp * E), jnp.float32),
        jax.ShapeDtypeStruct((S + 1, Bp), jnp.float32),
    )

    dec_flat, td = pl.pallas_call(
        functools.partial(_fused_kernel, S, E, Bt),
        grid=(n_chunks,),
        in_specs=in_specs,
        out_specs=out_specs,
        out_shape=out_shape,
        compiler_params=pltpu.CompilerParams(dimension_semantics=("parallel",)),
    )(x_sc, x_fb, p["wp1m"], p["wp1s"], p["bp1"], p["wp2"], p["bp2"], p["wp3"],
      p["a_ma"], rv,
      p["trend_w1"], p["trend_b1"], p["trend_w2"], p["trend_b2"],
      p["trend_w3"], p["trend_b3"])

    dec_out = dec_flat.reshape(P, Bp, E).transpose(1, 0, 2)[:B]   # (B, P, E)
    delta = td[:S, :B].T                                          # (B, S)
    tau = td[S, :B].reshape(B, 1)                                 # (B, 1) (exp'ed)
    return dec_out, tau, delta


def model_forward(params, cfg, x_enc, x_mark_enc, x_dec, x_mark_dec):
    # x_mark_enc / x_dec / x_mark_dec feed only the omitted seasonal branch.
    del x_mark_enc, x_dec, x_mark_dec
    return fused_forward(x_enc, params, cfg)


# ----------------------------------------------------------------------------
# Parameter initialization + packing (done once, outside the hot path)
# ----------------------------------------------------------------------------
def _moving_avg_matrix(S, k):
    """A @ x == replicate-padded AvgPool1d(k, stride=1) over time (series_decomp)."""
    pad = (k - 1) // 2
    rows = []
    for t in range(S):
        row = [0.0] * S
        for j in range(-pad, pad + 1):
            s = min(max(t + j, 0), S - 1)
            row[s] += 1.0 / k
        rows.append(row)
    return jnp.asarray(rows, dtype=jnp.float32)


def init_raw_params(key, cfg):
    E, S = cfg["enc_in"], cfg["seq_len"]
    H0, H1 = cfg["p_hidden_dims"]
    D, P = cfg["d_model"], cfg["pred_len"]
    ks = jax.random.split(key, 18)

    def u(k, shape, fan_in):
        b = 1.0 / float(fan_in) ** 0.5
        return jax.random.uniform(k, shape, jnp.float32, -b, b)

    return {
        # Projectors: Conv1d(seq_len->1, k=3, circular, no bias) + MLP(2E->H0->H1->out)
        # Linear weights kept in (in, out) layout.
        "tau_conv": u(ks[0], (S, 3), S * 3),
        "tau_w1": u(ks[1], (2 * E, H0), 2 * E), "tau_b1": u(ks[2], (1, H0), 2 * E),
        "tau_w2": u(ks[3], (H0, H1), H0), "tau_b2": u(ks[4], (1, H1), H0),
        "tau_w3": u(ks[5], (H1, 1), H1),
        "delta_conv": u(ks[6], (S, 3), S * 3),
        "delta_w1": u(ks[7], (2 * E, H0), 2 * E), "delta_b1": u(ks[8], (1, H0), 2 * E),
        "delta_w2": u(ks[9], (H0, H1), H0), "delta_b2": u(ks[10], (1, H1), H0),
        "delta_w3": u(ks[11], (H1, S), H1),
        # Trend MLP (torch (out, in) layout -> used as W @ x in-kernel)
        "trend_w1": u(ks[12], (D, S), S), "trend_b1": u(ks[13], (D, 1), S),
        "trend_w2": u(ks[14], (D, D), D), "trend_b2": u(ks[15], (D, 1), D),
        "trend_w3": u(ks[16], (P, D), D), "trend_b3": u(ks[17], (P, 1), D),
        # RevIN affine
        "revin_w": jnp.ones((1, E), jnp.float32),
        "revin_b": jnp.zeros((1, E), jnp.float32),
    }


def pack_params(raw, cfg):
    """Fold the circular conv into layer-1, merge tau/delta heads, prefold RevIN."""
    E, S = cfg["enc_in"], cfg["seq_len"]
    H0, H1 = cfg["p_hidden_dims"]

    def fold_conv(conv_w, w1a):
        # conv_w: (S, 3) = Conv1d weight[0]; w1a: (E, H) in (in, out) layout.
        # M[t*E+e, m] = sum_k conv_w[t, k] * w1a[(e - k + 1) mod E, m]
        rolled = jnp.stack([jnp.roll(w1a, k - 1, axis=0) for k in range(3)], axis=0)
        return jnp.einsum("tk,kem->tem", conv_w, rolled).reshape(S * E, -1)

    m_tau = fold_conv(raw["tau_conv"], raw["tau_w1"][:E])            # (S*E, H0)
    m_del = fold_conv(raw["delta_conv"], raw["delta_w1"][:E])        # (S*E, H0)
    wp1m = jnp.concatenate([m_tau, m_del], axis=1).T                 # (2H0, S*E)

    wp1s = jnp.zeros((2 * H0, 2 * E), jnp.float32)
    wp1s = wp1s.at[:H0, :E].set(raw["tau_w1"][E:].T)                 # tau <- std
    wp1s = wp1s.at[H0:, E:].set(raw["delta_w1"][E:].T)               # delta <- mean

    bp1 = jnp.concatenate([raw["tau_b1"], raw["delta_b1"]], axis=1).T  # (2H0, 1)
    wp2 = jnp.zeros((2 * H1, 2 * H0), jnp.float32)
    wp2 = wp2.at[:H1, :H0].set(raw["tau_w2"].T)
    wp2 = wp2.at[H1:, H0:].set(raw["delta_w2"].T)
    bp2 = jnp.concatenate([raw["tau_b2"], raw["delta_b2"]], axis=1).T  # (2H1, 1)

    # Layer-3 packed as [delta rows (S) ; tau row (1)] -> aligned stores, exp on tau only.
    wp3 = jnp.zeros((S + 1, 2 * H1), jnp.float32)
    wp3 = wp3.at[:S, H1:].set(raw["delta_w3"].T)
    wp3 = wp3.at[S:, :H1].set(raw["tau_w3"].T)

    revin3 = jnp.stack([
        raw["revin_w"][0],
        raw["revin_b"][0],
        1.0 / (raw["revin_w"][0] + EPS * EPS),                       # prefolded denorm recip
    ], axis=0)                                                       # (3, E)

    return {
        "wp1m": wp1m, "wp1s": wp1s, "bp1": bp1, "wp2": wp2, "bp2": bp2, "wp3": wp3,
        "a_ma": _moving_avg_matrix(S, cfg["moving_avg"]),
        "revin3": revin3,
        "trend_w1": raw["trend_w1"], "trend_b1": raw["trend_b1"],
        "trend_w2": raw["trend_w2"], "trend_b2": raw["trend_b2"],
        "trend_w3": raw["trend_w3"], "trend_b3": raw["trend_b3"],
    }


# ----------------------------------------------------------------------------
# Pure-JAX unfused reference of the same subset (for an in-script cross-check)
# ----------------------------------------------------------------------------
def reference_forward(raw, cfg, x):
    E, S = cfg["enc_in"], cfg["seq_len"]
    mean = jnp.mean(x, axis=1, keepdims=True)                        # (B,1,E)
    xc = x - mean
    std = jnp.sqrt(jnp.mean(xc * xc, axis=1, keepdims=True) + EPS)
    xn = xc / std

    def projector(conv_w, w1, b1, w2, b2, w3, stats):
        shift = (jnp.arange(E)[:, None] + jnp.arange(3)[None, :] - 1) % E   # (E,3)
        xg = x[:, :, shift]                                          # (B,S,E,3)
        conv = jnp.einsum("bsek,sk->be", xg, conv_w)                 # circular conv
        inp = jnp.concatenate([conv, stats[:, 0, :]], axis=1)        # (B,2E)
        h = jax.nn.relu(inp @ w1 + b1)
        h = jax.nn.relu(h @ w2 + b2)
        return h @ w3

    tau = jnp.exp(projector(raw["tau_conv"], raw["tau_w1"], raw["tau_b1"],
                            raw["tau_w2"], raw["tau_b2"], raw["tau_w3"], std))
    delta = projector(raw["delta_conv"], raw["delta_w1"], raw["delta_b1"],
                      raw["delta_w2"], raw["delta_b2"], raw["delta_w3"], mean)

    a_ma = _moving_avg_matrix(S, cfg["moving_avg"])
    trend = jnp.einsum("ts,bse->bte", a_ma, xn)
    r_mean = jnp.mean(trend, axis=1, keepdims=True)
    tc = trend - r_mean
    r_std = jnp.sqrt(jnp.mean(tc * tc, axis=1, keepdims=True) + EPS)
    tn = (tc / r_std) * raw["revin_w"][0] + raw["revin_b"][0]
    z = tn.transpose(0, 2, 1)                                        # (B,E,S)
    z = jax.nn.relu(z @ raw["trend_w1"].T + raw["trend_b1"][:, 0])
    z = jax.nn.relu(z @ raw["trend_w2"].T + raw["trend_b2"][:, 0])
    z = z @ raw["trend_w3"].T + raw["trend_b3"][:, 0]                # (B,E,P)
    out = z.transpose(0, 2, 1)                                       # (B,P,E)
    out = (out - raw["revin_b"][0]) / (raw["revin_w"][0] + EPS * EPS)
    out = out * r_std + r_mean
    return out * std + mean, tau, delta


if __name__ == "__main__":
    cfg = {
        "enc_in": 8, "seq_len": 16, "label_len": 8, "pred_len": 8,
        "d_model": 32, "p_hidden_dims": [32, 32], "p_hidden_layers": 2,
        "moving_avg": 5,
    }
    B = 4
    key = jax.random.PRNGKey(0)
    kp, k1, k2, k3, k4 = jax.random.split(key, 5)

    raw = init_raw_params(kp, cfg)
    params = pack_params(raw, cfg)

    x_enc = jax.random.normal(k1, (B, cfg["seq_len"], cfg["enc_in"]), jnp.float32)
    x_mark_enc = jax.random.normal(k2, (B, cfg["seq_len"], 4), jnp.float32)
    x_dec = jax.random.normal(
        k3, (B, cfg["label_len"] + cfg["pred_len"], cfg["enc_in"]), jnp.float32)
    x_mark_dec = jax.random.normal(
        k4, (B, cfg["label_len"] + cfg["pred_len"], 4), jnp.float32)

    fwd = jax.jit(functools.partial(model_forward, params, cfg))
    dec_out, tau, delta = fwd(x_enc, x_mark_enc, x_dec, x_mark_dec)
    jax.block_until_ready((dec_out, tau, delta))

    assert dec_out.shape == (B, cfg["pred_len"], cfg["enc_in"])
    assert tau.shape == (B, 1) and delta.shape == (B, cfg["seq_len"])

    # Cross-check the fused kernel against the unfused pure-JAX reference.
    ref_dec, ref_tau, ref_delta = reference_forward(raw, cfg, x_enc)
    for name, a, b in (("dec_out", dec_out, ref_dec),
                       ("tau", tau, ref_tau),
                       ("delta", delta, ref_delta)):
        err = float(jnp.max(jnp.abs(a - b)))
        assert err < 5e-2, f"{name} mismatch: max abs err {err}"

    print("KERNEL_OK")
</pallas_src>

<mosaic_0001>
module attributes {stable_mosaic.version = 11 : i64} {
  func.func @_fused_kernel(%arg0: i32, %arg1: memref<16x128xf32, #tpu.memory_space<vmem>>, %arg2: memref<128x16xf32, #tpu.memory_space<vmem>>, %arg3: memref<64x128xf32, #tpu.memory_space<vmem>>, %arg4: memref<64x16xf32, #tpu.memory_space<vmem>>, %arg5: memref<64x1xf32, #tpu.memory_space<vmem>>, %arg6: memref<64x64xf32, #tpu.memory_space<vmem>>, %arg7: memref<64x1xf32, #tpu.memory_space<vmem>>, %arg8: memref<17x64xf32, #tpu.memory_space<vmem>>, %arg9: memref<16x16xf32, #tpu.memory_space<vmem>>, %arg10: memref<3x128xf32, #tpu.memory_space<vmem>>, %arg11: memref<32x16xf32, #tpu.memory_space<vmem>>, %arg12: memref<32x1xf32, #tpu.memory_space<vmem>>, %arg13: memref<32x32xf32, #tpu.memory_space<vmem>>, %arg14: memref<32x1xf32, #tpu.memory_space<vmem>>, %arg15: memref<8x32xf32, #tpu.memory_space<vmem>>, %arg16: memref<8x1xf32, #tpu.memory_space<vmem>>, %arg17: memref<8x128xf32, #tpu.memory_space<vmem>>, %arg18: memref<17x16xf32, #tpu.memory_space<vmem>>) attributes {dimension_semantics = [#tpu.dimension_semantics<parallel>], iteration_bounds = array<i64: 1>, scalar_prefetch = 0 : i64, scratch_operands = 0 : i64, tpu.core_type = #tpu.core_type<tc>, window_params = [{transform_indices = @transform_0, window_bounds = array<i64: 16, 128>}, {transform_indices = @transform_1, window_bounds = array<i64: 128, 16>}, {pipeline_mode = #tpu.pipeline_mode<synchronous>, transform_indices = @transform_2, window_bounds = array<i64: 64, 128>}, {pipeline_mode = #tpu.pipeline_mode<synchronous>, transform_indices = @transform_3, window_bounds = array<i64: 64, 16>}, {pipeline_mode = #tpu.pipeline_mode<synchronous>, transform_indices = @transform_4, window_bounds = array<i64: 64, 1>}, {pipeline_mode = #tpu.pipeline_mode<synchronous>, transform_indices = @transform_5, window_bounds = array<i64: 64, 64>}, {pipeline_mode = #tpu.pipeline_mode<synchronous>, transform_indices = @transform_6, window_bounds = array<i64: 64, 1>}, {pipeline_mode = #tpu.pipeline_mode<synchronous>, transform_indices = @transform_7, window_bounds = array<i64: 17, 64>}, {pipeline_mode = #tpu.pipeline_mode<synchronous>, transform_indices = @transform_8, window_bounds = array<i64: 16, 16>}, {pipeline_mode = #tpu.pipeline_mode<synchronous>, transform_indices = @transform_9, window_bounds = array<i64: 3, 128>}, {pipeline_mode = #tpu.pipeline_mode<synchronous>, transform_indices = @transform_10, window_bounds = array<i64: 32, 16>}, {pipeline_mode = #tpu.pipeline_mode<synchronous>, transform_indices = @transform_11, window_bounds = array<i64: 32, 1>}, {pipeline_mode = #tpu.pipeline_mode<synchronous>, transform_indices = @transform_12, window_bounds = array<i64: 32, 32>}, {pipeline_mode = #tpu.pipeline_mode<synchronous>, transform_indices = @transform_13, window_bounds = array<i64: 32, 1>}, {pipeline_mode = #tpu.pipeline_mode<synchronous>, transform_indices = @transform_14, window_bounds = array<i64: 8, 32>}, {pipeline_mode = #tpu.pipeline_mode<synchronous>, transform_indices = @transform_15, window_bounds = array<i64: 8, 1>}, {transform_indices = @transform_16, window_bounds = array<i64: 8, 128>}, {transform_indices = @transform_17, window_bounds = array<i64: 17, 16>}]} {
    %c0 = arith.constant 0 : index
    %c0_0 = arith.constant 0 : index
    %0 = vector.load %arg1[%c0, %c0_0] : memref<16x128xf32, #tpu.memory_space<vmem>>, vector<16x128xf32>
    %cst = arith.constant dense<0.000000e+00> : vector<128xf32>
    %1 = vector.multi_reduction <add>, %0, %cst [0] : vector<16x128xf32> to vector<128xf32>
    %2 = vector.shape_cast %1 : vector<128xf32> to vector<1x128xf32>
    %cst_1 = arith.constant 1.600000e+01 : f32
    %3 = vector.broadcast %cst_1 : f32 to vector<1x128xf32>
    %4 = arith.divf %2, %3 : vector<1x128xf32>
    %5 = vector.broadcast %4 : vector<1x128xf32> to vector<16x128xf32>
    %6 = arith.subf %0, %5 : vector<16x128xf32>
    %7 = arith.mulf %6, %6 : vector<16x128xf32>
    %cst_2 = arith.constant dense<0.000000e+00> : vector<128xf32>
    %8 = vector.multi_reduction <add>, %7, %cst_2 [0] : vector<16x128xf32> to vector<128xf32>
    %9 = vector.shape_cast %8 : vector<128xf32> to vector<1x128xf32>
    %cst_3 = arith.constant 1.600000e+01 : f32
    %10 = vector.broadcast %cst_3 : f32 to vector<1x128xf32>
    %11 = arith.divf %9, %10 : vector<1x128xf32>
    %cst_4 = arith.constant 9.99999974E-6 : f32
    %12 = vector.broadcast %cst_4 : f32 to vector<1x128xf32>
    %13 = arith.addf %11, %12 : vector<1x128xf32>
    %14 = math.rsqrt %13 : vector<1x128xf32>
    %15 = arith.mulf %13, %14 : vector<1x128xf32>
    %16 = vector.broadcast %14 : vector<1x128xf32> to vector<16x128xf32>
    %17 = arith.mulf %6, %16 : vector<16x128xf32>
    %c0_5 = arith.constant 0 : index
    %c0_6 = arith.constant 0 : index
    %18 = vector.load %arg2[%c0_5, %c0_6] : memref<128x16xf32, #tpu.memory_space<vmem>>, vector<128x16xf32>
    %19 = vector.shape_cast %18 : vector<128x16xf32> to vector<16x8x16xf32>
    %cst_7 = arith.constant dense<0.000000e+00> : vector<8x16xf32>
    %20 = vector.multi_reduction <add>, %19, %cst_7 [0] : vector<16x8x16xf32> to vector<8x16xf32>
    %cst_8 = arith.constant 1.600000e+01 : f32
    %21 = vector.broadcast %cst_8 : f32 to vector<8x16xf32>
    %22 = arith.divf %20, %21 : vector<8x16xf32>
    %23 = vector.shape_cast %22 : vector<8x16xf32> to vector<1x8x16xf32>
    %24 = vector.broadcast %23 : vector<1x8x16xf32> to vector<16x8x16xf32>
    %25 = arith.subf %19, %24 : vector<16x8x16xf32>
    %26 = arith.mulf %25, %25 : vector<16x8x16xf32>
    %cst_9 = arith.constant dense<0.000000e+00> : vector<8x16xf32>
    %27 = vector.multi_reduction <add>, %26, %cst_9 [0] : vector<16x8x16xf32> to vector<8x16xf32>
    %cst_10 = arith.constant 1.600000e+01 : f32
    %28 = vector.broadcast %cst_10 : f32 to vector<8x16xf32>
    %29 = arith.divf %27, %28 : vector<8x16xf32>
    %cst_11 = arith.constant 9.99999974E-6 : f32
    %30 = vector.broadcast %cst_11 : f32 to vector<8x16xf32>
    %31 = arith.addf %29, %30 : vector<8x16xf32>
    %32 = math.rsqrt %31 : vector<8x16xf32>
    %33 = arith.mulf %31, %32 : vector<8x16xf32>
    %34 = tpu.concatenate %33, %22 in 0 : vector<8x16xf32>, vector<8x16xf32> -> vector<16x16xf32>
    %c0_12 = arith.constant 0 : index
    %c0_13 = arith.constant 0 : index
    %35 = vector.load %arg3[%c0_12, %c0_13] : memref<64x128xf32, #tpu.memory_space<vmem>>, vector<64x128xf32>
    %cst_14 = arith.constant dense<0.000000e+00> : vector<64x16xf32>
    %36 = tpu.matmul %35, %18, %cst_14 {dimension_numbers = #tpu.dot_dimension_numbers<[1], [0], [0], [1], [0, 0, 1, 1], [], []>} : vector<64x128xf32>, vector<128x16xf32>, vector<64x16xf32> -> vector<64x16xf32>
    %c0_15 = arith.constant 0 : index
    %c0_16 = arith.constant 0 : index
    %37 = vector.load %arg4[%c0_15, %c0_16] : memref<64x16xf32, #tpu.memory_space<vmem>>, vector<64x16xf32>
    %cst_17 = arith.constant dense<0.000000e+00> : vector<64x16xf32>
    %38 = tpu.matmul %37, %34, %cst_17 {dimension_numbers = #tpu.dot_dimension_numbers<[1], [0], [0], [1], [0, 0, 1, 1], [], []>} : vector<64x16xf32>, vector<16x16xf32>, vector<64x16xf32> -> vector<64x16xf32>
    %39 = arith.addf %36, %38 : vector<64x16xf32>
    %c0_18 = arith.constant 0 : index
    %c0_19 = arith.constant 0 : index
    %40 = vector.load %arg5[%c0_18, %c0_19] : memref<64x1xf32, #tpu.memory_space<vmem>>, vector<64x1xf32>
    %41 = vector.broadcast %40 : vector<64x1xf32> to vector<64x16xf32>
    %42 = arith.addf %39, %41 : vector<64x16xf32>
    %cst_20 = arith.constant 0.000000e+00 : f32
    %43 = vector.broadcast %cst_20 : f32 to vector<64x16xf32>
    %44 = arith.maximumf %42, %43 : vector<64x16xf32>
    %c0_21 = arith.constant 0 : index
    %c0_22 = arith.constant 0 : index
    %45 = vector.load %arg6[%c0_21, %c0_22] : memref<64x64xf32, #tpu.memory_space<vmem>>, vector<64x64xf32>
    %cst_23 = arith.constant dense<0.000000e+00> : vector<64x16xf32>
    %46 = tpu.matmul %45, %44, %cst_23 {dimension_numbers = #tpu.dot_dimension_numbers<[1], [0], [0], [1], [0, 0, 1, 1], [], []>} : vector<64x64xf32>, vector<64x16xf32>, vector<64x16xf32> -> vector<64x16xf32>
    %c0_24 = arith.constant 0 : index
    %c0_25 = arith.constant 0 : index
    %47 = vector.load %arg7[%c0_24, %c0_25] : memref<64x1xf32, #tpu.memory_space<vmem>>, vector<64x1xf32>
    %48 = vector.broadcast %47 : vector<64x1xf32> to vector<64x16xf32>
    %49 = arith.addf %46, %48 : vector<64x16xf32>
    %cst_26 = arith.constant 0.000000e+00 : f32
    %50 = vector.broadcast %cst_26 : f32 to vector<64x16xf32>
    %51 = arith.maximumf %49, %50 : vector<64x16xf32>
    %c0_27 = arith.constant 0 : index
    %c0_28 = arith.constant 0 : index
    %52 = vector.load %arg8[%c0_27, %c0_28] : memref<17x64xf32, #tpu.memory_space<vmem>>, vector<17x64xf32>
    %cst_29 = arith.constant dense<0.000000e+00> : vector<17x16xf32>
    %53 = tpu.matmul %52, %51, %cst_29 {dimension_numbers = #tpu.dot_dimension_numbers<[1], [0], [0], [1], [0, 0, 1, 1], [], []>} : vector<17x64xf32>, vector<64x16xf32>, vector<17x16xf32> -> vector<17x16xf32>
    %54 = vector.extract_strided_slice %53 {offsets = [0, 0], sizes = [16, 16], strides = [1, 1]} : vector<17x16xf32> to vector<16x16xf32>
    %c0_30 = arith.constant 0 : index
    %c0_31 = arith.constant 0 : index
    %55 = vector.load %arg18[%c0_30, %c0_31] : memref<17x16xf32, #tpu.memory_space<vmem>>, vector<16x16xf32>
    tpu.vector_store %arg18[%c0_30, %c0_31], %54 {strides = array<i32>} : memref<17x16xf32, #tpu.memory_space<vmem>>, vector<16x16xf32>,
    %56 = vector.extract_strided_slice %53 {offsets = [16, 0], sizes = [1, 16], strides = [1, 1]} : vector<17x16xf32> to vector<1x16xf32>
    %57 = math.exp %56 : vector<1x16xf32>
    %c16 = arith.constant 16 : index
    %c0_32 = arith.constant 0 : index
    %58 = vector.load %arg18[%c16, %c0_32] : memref<17x16xf32, #tpu.memory_space<vmem>>, vector<1x16xf32>
    tpu.vector_store %arg18[%c16, %c0_32], %57 {strides = array<i32>} : memref<17x16xf32, #tpu.memory_space<vmem>>, vector<1x16xf32>,
    %c0_33 = arith.constant 0 : index
    %c0_34 = arith.constant 0 : index
    %59 = vector.load %arg9[%c0_33, %c0_34] : memref<16x16xf32, #tpu.memory_space<vmem>>, vector<16x16xf32>
    %cst_35 = arith.constant dense<0.000000e+00> : vector<16x128xf32>
    %60 = tpu.matmul %59, %17, %cst_35 {dimension_numbers = #tpu.dot_dimension_numbers<[1], [0], [0], [1], [0, 0, 1, 1], [], []>} : vector<16x16xf32>, vector<16x128xf32>, vector<16x128xf32> -> vector<16x128xf32>
    %cst_36 = arith.constant dense<0.000000e+00> : vector<128xf32>
    %61 = vector.multi_reduction <add>, %60, %cst_36 [0] : vector<16x128xf32> to vector<128xf32>
    %62 = vector.shape_cast %61 : vector<128xf32> to vector<1x128xf32>
    %cst_37 = arith.constant 1.600000e+01 : f32
    %63 = vector.broadcast %cst_37 : f32 to vector<1x128xf32>
    %64 = arith.divf %62, %63 : vector<1x128xf32>
    %65 = vector.broadcast %64 : vector<1x128xf32> to vector<16x128xf32>
    %66 = arith.subf %60, %65 : vector<16x128xf32>
    %67 = arith.mulf %66, %66 : vector<16x128xf32>
    %cst_38 = arith.constant dense<0.000000e+00> : vector<128xf32>
    %68 = vector.multi_reduction <add>, %67, %cst_38 [0] : vector<16x128xf32> to vector<128xf32>
    %69 = vector.shape_cast %68 : vector<128xf32> to vector<1x128xf32>
    %cst_39 = arith.constant 1.600000e+01 : f32
    %70 = vector.broadcast %cst_39 : f32 to vector<1x128xf32>
    %71 = arith.divf %69, %70 : vector<1x128xf32>
    %cst_40 = arith.constant 9.99999974E-6 : f32
    %72 = vector.broadcast %cst_40 : f32 to vector<1x128xf32>
    %73 = arith.addf %71, %72 : vector<1x128xf32>
    %74 = math.rsqrt %73 : vector<1x128xf32>
    %75 = arith.mulf %73, %74 : vector<1x128xf32>
    %c0_41 = arith.constant 0 : index
    %c0_42 = arith.constant 0 : index
    %76 = vector.load %arg10[%c0_41, %c0_42] : memref<3x128xf32, #tpu.memory_space<vmem>>, vector<1x128xf32>
    %c1 = arith.constant 1 : index
    %c0_43 = arith.constant 0 : index
    %77 = vector.load %arg10[%c1, %c0_43] : memref<3x128xf32, #tpu.memory_space<vmem>>, vector<1x128xf32>
    %c2 = arith.constant 2 : index
    %c0_44 = arith.constant 0 : index
    %78 = vector.load %arg10[%c2, %c0_44] : memref<3x128xf32, #tpu.memory_space<vmem>>, vector<1x128xf32>
    %79 = vector.broadcast %74 : vector<1x128xf32> to vector<16x128xf32>
    %80 = arith.mulf %66, %79 : vector<16x128xf32>
    %81 = vector.broadcast %76 : vector<1x128xf32> to vector<16x128xf32>
    %82 = arith.mulf %80, %81 : vector<16x128xf32>
    %83 = vector.broadcast %77 : vector<1x128xf32> to vector<16x128xf32>
    %84 = arith.addf %82, %83 : vector<16x128xf32>
    %c0_45 = arith.constant 0 : index
    %c0_46 = arith.constant 0 : index
    %85 = vector.load %arg11[%c0_45, %c0_46] : memref<32x16xf32, #tpu.memory_space<vmem>>, vector<32x16xf32>
    %cst_47 = arith.constant dense<0.000000e+00> : vector<32x128xf32>
    %86 = tpu.matmul %85, %84, %cst_47 {dimension_numbers = #tpu.dot_dimension_numbers<[1], [0], [0], [1], [0, 0, 1, 1], [], []>} : vector<32x16xf32>, vector<16x128xf32>, vector<32x128xf32> -> vector<32x128xf32>
    %c0_48 = arith.constant 0 : index
    %c0_49 = arith.constant 0 : index
    %87 = vector.load %arg12[%c0_48, %c0_49] : memref<32x1xf32, #tpu.memory_space<vmem>>, vector<32x1xf32>
    %88 = vector.broadcast %87 : vector<32x1xf32> to vector<32x128xf32>
    %89 = arith.addf %86, %88 : vector<32x128xf32>
    %cst_50 = arith.constant 0.000000e+00 : f32
    %90 = vector.broadcast %cst_50 : f32 to vector<32x128xf32>
    %91 = arith.maximumf %89, %90 : vector<32x128xf32>
    %c0_51 = arith.constant 0 : index
    %c0_52 = arith.constant 0 : index
    %92 = vector.load %arg13[%c0_51, %c0_52] : memref<32x32xf32, #tpu.memory_space<vmem>>, vector<32x32xf32>
    %cst_53 = arith.constant dense<0.000000e+00> : vector<32x128xf32>
    %93 = tpu.matmul %92, %91, %cst_53 {dimension_numbers = #tpu.dot_dimension_numbers<[1], [0], [0], [1], [0, 0, 1, 1], [], []>} : vector<32x32xf32>, vector<32x128xf32>, vector<32x128xf32> -> vector<32x128xf32>
    %c0_54 = arith.constant 0 : index
    %c0_55 = arith.constant 0 : index
    %94 = vector.load %arg14[%c0_54, %c0_55] : memref<32x1xf32, #tpu.memory_space<vmem>>, vector<32x1xf32>
    %95 = vector.broadcast %94 : vector<32x1xf32> to vector<32x128xf32>
    %96 = arith.addf %93, %95 : vector<32x128xf32>
    %cst_56 = arith.constant 0.000000e+00 : f32
    %97 = vector.broadcast %cst_56 : f32 to vector<32x128xf32>
    %98 = arith.maximumf %96, %97 : vector<32x128xf32>
    %c0_57 = arith.constant 0 : index
    %c0_58 = arith.constant 0 : index
    %99 = vector.load %arg15[%c0_57, %c0_58] : memref<8x32xf32, #tpu.memory_space<vmem>>, vector<8x32xf32>
    %cst_59 = arith.constant dense<0.000000e+00> : vector<8x128xf32>
    %100 = tpu.matmul %99, %98, %cst_59 {dimension_numbers = #tpu.dot_dimension_numbers<[1], [0], [0], [1], [0, 0, 1, 1], [], []>} : vector<8x32xf32>, vector<32x128xf32>, vector<8x128xf32> -> vector<8x128xf32>
    %c0_60 = arith.constant 0 : index
    %c0_61 = arith.constant 0 : index
    %101 = vector.load %arg16[%c0_60, %c0_61] : memref<8x1xf32, #tpu.memory_space<vmem>>, vector<8x1xf32>
    %102 = vector.broadcast %101 : vector<8x1xf32> to vector<8x128xf32>
    %103 = arith.addf %100, %102 : vector<8x128xf32>
    %104 = vector.broadcast %77 : vector<1x128xf32> to vector<8x128xf32>
    %105 = arith.subf %103, %104 : vector<8x128xf32>
    %106 = vector.broadcast %78 : vector<1x128xf32> to vector<8x128xf32>
    %107 = arith.mulf %105, %106 : vector<8x128xf32>
    %108 = vector.broadcast %75 : vector<1x128xf32> to vector<8x128xf32>
    %109 = arith.mulf %107, %108 : vector<8x128xf32>
    %110 = vector.broadcast %64 : vector<1x128xf32> to vector<8x128xf32>
    %111 = arith.addf %109, %110 : vector<8x128xf32>
    %112 = vector.broadcast %15 : vector<1x128xf32> to vector<8x128xf32>
    %113 = arith.mulf %111, %112 : vector<8x128xf32>
    %114 = vector.broadcast %4 : vector<1x128xf32> to vector<8x128xf32>
    %115 = arith.addf %113, %114 : vector<8x128xf32>
    %c0_62 = arith.constant 0 : index
    %c0_63 = arith.constant 0 : index
    %116 = vector.load %arg17[%c0_62, %c0_63] : memref<8x128xf32, #tpu.memory_space<vmem>>, vector<8x128xf32>
    tpu.vector_store %arg17[%c0_62, %c0_63], %115 {strides = array<i32>} : memref<8x128xf32, #tpu.memory_space<vmem>>, vector<8x128xf32>,
    return
  }
  func.func @transform_0(%arg0: i32) -> (i32, i32) {
    %c0_i32 = arith.constant 0 : i32
    %c0_i32_0 = arith.constant 0 : i32
    return %c0_i32, %arg0 : i32, i32
  }
  func.func @transform_1(%arg0: i32) -> (i32, i32) {
    %c0_i32 = arith.constant 0 : i32
    %c0_i32_0 = arith.constant 0 : i32
    return %c0_i32, %arg0 : i32, i32
  }
  func.func @transform_2(%arg0: i32) -> (i32, i32) {
    %c0_i32 = arith.constant 0 : i32
    %c0_i32_0 = arith.constant 0 : i32
    %c0_i32_1 = arith.constant 0 : i32
    return %c0_i32, %c0_i32_0 : i32, i32
  }
  func.func @transform_3(%arg0: i32) -> (i32, i32) {
    %c0_i32 = arith.constant 0 : i32
    %c0_i32_0 = arith.constant 0 : i32
    %c0_i32_1 = arith.constant 0 : i32
    return %c0_i32, %c0_i32_0 : i32, i32
  }
  func.func @transform_4(%arg0: i32) -> (i32, i32) {
    %c0_i32 = arith.constant 0 : i32
    %c0_i32_0 = arith.constant 0 : i32
    %c0_i32_1 = arith.constant 0 : i32
    return %c0_i32, %c0_i32_0 : i32, i32
  }
  func.func @transform_5(%arg0: i32) -> (i32, i32) {
    %c0_i32 = arith.constant 0 : i32
    %c0_i32_0 = arith.constant 0 : i32
    %c0_i32_1 = arith.constant 0 : i32
    return %c0_i32, %c0_i32_0 : i32, i32
  }
  func.func @transform_6(%arg0: i32) -> (i32, i32) {
    %c0_i32 = arith.constant 0 : i32
    %c0_i32_0 = arith.constant 0 : i32
    %c0_i32_1 = arith.constant 0 : i32
    return %c0_i32, %c0_i32_0 : i32, i32
  }
  func.func @transform_7(%arg0: i32) -> (i32, i32) {
    %c0_i32 = arith.constant 0 : i32
    %c0_i32_0 = arith.constant 0 : i32
    %c0_i32_1 = arith.constant 0 : i32
    return %c0_i32, %c0_i32_0 : i32, i32
  }
  func.func @transform_8(%arg0: i32) -> (i32, i32) {
    %c0_i32 = arith.constant 0 : i32
    %c0_i32_0 = arith.constant 0 : i32
    %c0_i32_1 = arith.constant 0 : i32
    return %c0_i32, %c0_i32_0 : i32, i32
  }
  func.func @transform_9(%arg0: i32) -> (i32, i32) {
    %c0_i32 = arith.constant 0 : i32
    %c0_i32_0 = arith.constant 0 : i32
    %c0_i32_1 = arith.constant 0 : i32
    return %c0_i32, %c0_i32_0 : i32, i32
  }
  func.func @transform_10(%arg0: i32) -> (i32, i32) {
    %c0_i32 = arith.constant 0 : i32
    %c0_i32_0 = arith.constant 0 : i32
    %c0_i32_1 = arith.constant 0 : i32
    return %c0_i32, %c0_i32_0 : i32, i32
  }
  func.func @transform_11(%arg0: i32) -> (i32, i32) {
    %c0_i32 = arith.constant 0 : i32
    %c0_i32_0 = arith.constant 0 : i32
    %c0_i32_1 = arith.constant 0 : i32
    return %c0_i32, %c0_i32_0 : i32, i32
  }
  func.func @transform_12(%arg0: i32) -> (i32, i32) {
    %c0_i32 = arith.constant 0 : i32
    %c0_i32_0 = arith.constant 0 : i32
    %c0_i32_1 = arith.constant 0 : i32
    return %c0_i32, %c0_i32_0 : i32, i32
  }
  func.func @transform_13(%arg0: i32) -> (i32, i32) {
    %c0_i32 = arith.constant 0 : i32
    %c0_i32_0 = arith.constant 0 : i32
    %c0_i32_1 = arith.constant 0 : i32
    return %c0_i32, %c0_i32_0 : i32, i32
  }
  func.func @transform_14(%arg0: i32) -> (i32, i32) {
    %c0_i32 = arith.constant 0 : i32
    %c0_i32_0 = arith.constant 0 : i32
    %c0_i32_1 = arith.constant 0 : i32
    return %c0_i32, %c0_i32_0 : i32, i32
  }
  func.func @transform_15(%arg0: i32) -> (i32, i32) {
    %c0_i32 = arith.constant 0 : i32
    %c0_i32_0 = arith.constant 0 : i32
    %c0_i32_1 = arith.constant 0 : i32
    return %c0_i32, %c0_i32_0 : i32, i32
  }
  func.func @transform_16(%arg0: i32) -> (i32, i32) {
    %c0_i32 = arith.constant 0 : i32
    %c0_i32_0 = arith.constant 0 : i32
    return %c0_i32, %arg0 : i32, i32
  }
  func.func @transform_17(%arg0: i32) -> (i32, i32) {
    %c0_i32 = arith.constant 0 : i32
    %c0_i32_0 = arith.constant 0 : i32
    return %c0_i32, %arg0 : i32, i32
  }
}

</mosaic_0001>

<bundles_post_ra>
// kernel: tile.7
= control target key start
LH: loop header
LB: loop body
LE: loop exit
PB: predicated region body
PF: predicated region fallthrough
CT: control target
= control target key end

     0   :  { %vm6_vm0 = vcmask 1042434   ;;  %s11_s6 = smov 3  ;;  %s33_s11 = smov 3  ;;  %vm8_vm1 = vcmask 64512   ;;  %vm19_vm2 = vcmask 1048512   ;;  %vm30_vm3 = vcmask 982912   ;;  %s367_s0 = inlined_call_operand.vmem [shape: f32[3,16,8], index: 0, kind: input, shape index: {}]   ;;  %s368_s1 = inlined_call_operand.vmem [shape: f32[3,128], index: 1, kind: output, shape index: {}]  }
   0x1   :  { %v183_v0 = vld [vmem:[%s367_s0 + $0x2d] sm:$0x4]   ;;  %v187_v2 = vld [vmem:[%s367_s0 + $0x2b] sm:$0x4]   ;;  %s22_s16 = smov 3  ;;  %s227_s17 = smov 120  }
   0x2   :  { %v182_v1 = vld [vmem:[%s367_s0 + $0xf] ss:$16 sm:%s11_s6]   ;;  %v186_v4 = vld [vmem:[%s367_s0 + $0xd] ss:$16 sm:%s33_s11]   ;;  %s44_s18 = smov 3  ;;  %s228_s19 = smov 104  }
   0x3   :  { %v16_v3 = vsel %vm6_vm0, %v183_v0, %v182_v1  ;;  %v38_v5 = vsel %vm6_vm0, %v187_v2, %v186_v4  ;;  %v184_v6 = vld [vmem:[%s367_s0 + $0xe] ss:$16 sm:%s22_s16]   ;;  %v188_v8 = vld [vmem:[%s367_s0 + $0xc] ss:$16 sm:%s44_s18]   ;;  %s55_s28 = smov 3  ;;  %s77_s2 = smov 3 }
   0x4   :  { %17 = vrot.lane.b32.xlu0 %v16_v3, %s227_s17  ;;  %39 = vrot.lane.b32.xlu1 %v38_v5, %s228_s19  ;;  %v185_v7 = vld [vmem:[%s367_s0 + $0x2c] sm:$0x4]   ;;  %v189_v9 = vld [vmem:[%s367_s0 + $0x2a] sm:$0x4]   ;;  %s229_s5 = smov 112   ;;  %s88_s6 = smov 3 }
   0x5   :  { %v27_v10 = vsel %vm6_vm0, %v185_v7, %v184_v6  ;;  %v191_v11 = vld [vmem:[%s367_s0 + $0x29] sm:$0x4]   ;;  %v49_v12 = vsel %vm6_vm0, %v189_v9, %v188_v8  ;;  %s230_s7 = smov 88   ;;  %s66_s8 = smov 3  ;;  %v194_v15 = vld [vmem:[%s367_s0 + $0x9] ss:$16 sm:%s77_s2]  }
   0x6   :  { %v190_v13 = vld [vmem:[%s367_s0 + $0xb] ss:$16 sm:%s55_s28]   ;;  %s231_s9 = smov 96   ;;  %v195_v16 = vld [vmem:[%s367_s0 + $0x27] sm:$0x4]   ;;  %s110_s22 = smov 3 }
   0x7   :  { %v60_v14 = vsel %vm6_vm0, %v191_v11, %v190_v13  ;;  %v192_v17 = vld [vmem:[%s367_s0 + $0xa] ss:$16 sm:%s66_s8]   ;;  %v196_v19 = vld [vmem:[%s367_s0 + $0x8] ss:$16 sm:%s88_s6]   ;;  %v82_v21 = vsel %vm6_vm0, %v195_v16, %v194_v15  ;;  %s99_s23 = smov 3  ;;  %s232_s24 = smov 72  }
   0x8   :  { %61 = vrot.lane.b32.xlu2 %v60_v14, %s230_s7  ;;  %v193_v18 = vld [vmem:[%s367_s0 + $0x28] sm:$0x4]   ;;  %v197_v20 = vld [vmem:[%s367_s0 + $0x26] sm:$0x4]   ;;  %s121_s25 = smov 3  ;;  %s233_s26 = smov 80  }
   0x9   :  { %v71_v22 = vsel %vm6_vm0, %v193_v18, %v192_v17  ;;  %v93_v23 = vsel %vm6_vm0, %v197_v20, %v196_v19  ;;  %s234_s27 = smov 64   ;;  %v200_v24 = vld [vmem:[%s367_s0 + $0x6] ss:$16 sm:%s110_s22]   ;;  %v198_v26 = vld [vmem:[%s367_s0 + $0x7] ss:$16 sm:%s99_s23]   ;;  %s143_s11 = smov 3 }
   0xa   :  { %v201_v25 = vld [vmem:[%s367_s0 + $0x24] sm:$0x4]   ;;  %v199_v27 = vld [vmem:[%s367_s0 + $0x25] sm:$0x4]   ;;  %v202_v28 = vld [vmem:[%s367_s0 + $0x5] ss:$16 sm:%s121_s25]  }
   0xb   :  { %v203_v29 = vld [vmem:[%s367_s0 + $0x23] sm:$0x4]   ;;  %v115_v30 = vsel %vm6_vm0, %v201_v25, %v200_v24  ;;  %v104_v31 = vsel %vm6_vm0, %v199_v27, %v198_v26  ;;  %s132_s12 = smov 3  ;;  %s235_s13 = smov 48   ;;  %v206_v33 = vld [vmem:[%s367_s0 + $0x3] ss:$16 sm:%s143_s11]  }
   0xc   :  { %28 = vrot.lane.b32.xlu0 %v27_v10, %s229_s5  ;;  %50 = vrot.lane.b32.xlu1 %v49_v12, %s231_s9  ;;  %v126_v32 = vsel %vm6_vm0, %v203_v29, %v202_v28  ;;  %s154_s14 = smov 3  ;;  %s236_s15 = smov 56   ;;  %v207_v34 = vld [vmem:[%s367_s0 + $0x21] sm:$0x4]   ;;  %v205_v36 = vld [vmem:[%s367_s0 + $0x22] sm:$0x4]  }
   0xd   :  { %s237_s16 = smov 40   ;;  %v204_v35 = vld [vmem:[%s367_s0 + $0x4] ss:$16 sm:%s132_s12]   ;;  %v208_v37 = vld [vmem:[%s367_s0 + $0x2] ss:$16 sm:%s154_s14]   ;;  %v148_v39 = vsel %vm6_vm0, %v207_v34, %v206_v33  ;;  %s165_s29 = smov 3 }
   0xe   :  { %v209_v38 = vld [vmem:[%s367_s0 + $0x20] sm:$0x4]   ;;  %v137_v40 = vsel %vm6_vm0, %v205_v36, %v204_v35  ;;  %s238_s30 = smov 24   ;;  %s239_s2 = smov 32   ;;  %v210_v42 = vld [vmem:[%s367_s0 + $0x1] ss:$16 sm:%s165_s29]  }
   0xf   :  { %v159_v41 = vsel %vm6_vm0, %v209_v38, %v208_v37  ;;  %s240_s3 = smov 16   ;;  %v211_v43 = vld [vmem:[%s367_s0 + $0x1f] sm:$0x4]   ;;  %s241_s8 = smov 8   ;;  %v181_v46 = vld [vmem:[%s367_s0 + $0x1e] sm:$0x4]  }
  0x10   :  { %72 = vrot.lane.b32.xlu2 %v71_v22, %s233_s26  ;;  %v170_v44 = vsel %vm6_vm0, %v211_v43, %v210_v42  ;;  %s2_s9 = smov 3  ;;  %vm41_vm4 = vcmask 917312   ;;  %vm52_vm5 = vcmask 851712   ;;  %vm63_vm6 = vcmask 786112  }
  0x11   :  { %v3_v45 = vld [vmem:[%s367_s0] ss:$16 sm:%s2_s9]   ;;  %vm74_vm7 = vcmask 720512   ;;  %vm85_vm8 = vcmask 654912   ;;  %vm96_vm9 = vcmask 589312   ;;  %vm107_vm10 = vcmask 523712  }
  0x12   :  { %v7_v47 = vsel %vm6_vm0, %v181_v46, %v3_v45  ;;  %vm118_vm11 = vcmask 458112   ;;  %vm129_vm12 = vcmask 392512   ;;  %vm140_vm13 = vcmask 326912  }
  0x13   :  { %9 = vst.msk [vmem:[#allocation0] sm:$0x7] %vm8_vm1, %v7_v47   ;;  %vm151_vm14 = vcmask 261312   ;;  %vm162_vm15 = vcmask 195712   ;;  %vm173_vm0 = vcmask 130112  }
  0x14   :  { %83 = vrot.lane.b32.xlu0 %v82_v21, %s232_s24  ;;  %94 = vrot.lane.b32.xlu1 %v93_v23, %s234_s27 }
  0x18   :  { %105 = vrot.lane.b32.xlu2 %v104_v31, %s236_s15 }
  0x1c   :  { %116 = vrot.lane.b32.xlu0 %v115_v30, %s235_s13  ;;  %127 = vrot.lane.b32.xlu1 %v126_v32, %s237_s16 }
  0x20   :  { %138 = vrot.lane.b32.xlu2 %v137_v40, %s239_s2 }
  0x24   :  { %149 = vrot.lane.b32.xlu0 %v148_v39, %s238_s30  ;;  %160 = vrot.lane.b32.xlu1 %v159_v41, %s240_s3 }
  0x28   :  { %171 = vrot.lane.b32.xlu2 %v170_v44, %s241_s8 }
  0x62   :  { %v62_v48 = vpop.permute.xlu2 %61  }
  0x6a   :  { %v73_v49 = vpop.permute.xlu2 %72  }
  0x72   :  { %v106_v51 = vpop.permute.xlu2 %105  }
  0x76   :  { %v18_v50 = vpop.permute.xlu0 %17   ;;  %v40_v52 = vpop.permute.xlu1 %39  }
  0x77   :  { %20 = vst.msk [vmem:[#allocation0] sm:$0x7] %vm19_vm2, %v18_v50  }
  0x7a   :  { %v139_v54 = vpop.permute.xlu2 %138  }
  0x7e   :  { %v29_v53 = vpop.permute.xlu0 %28   ;;  %v51_v55 = vpop.permute.xlu1 %50  }
  0x7f   :  { %31 = vst.msk [vmem:[#allocation0] sm:$0x7] %vm30_vm3, %v29_v53  }
  0x80   :  { %42 = vst.msk [vmem:[#allocation0] sm:$0x7] %vm41_vm4, %v40_v52  }
  0x81   :  { %53 = vst.msk [vmem:[#allocation0] sm:$0x7] %vm52_vm5, %v51_v55  }
  0x82   :  { %64 = vst.msk [vmem:[#allocation0] sm:$0x7] %vm63_vm6, %v62_v48   ;;  %v172_v57 = vpop.permute.xlu2 %171  }
  0x83   :  { %75 = vst.msk [vmem:[#allocation0] sm:$0x7] %vm74_vm7, %v73_v49  }
  0x86   :  { %v84_v56 = vpop.permute.xlu0 %83   ;;  %v95_v58 = vpop.permute.xlu1 %94  }
  0x87   :  { %86 = vst.msk [vmem:[#allocation0] sm:$0x7] %vm85_vm8, %v84_v56  }
  0x88   :  { %97 = vst.msk [vmem:[#allocation0] sm:$0x7] %vm96_vm9, %v95_v58  }
  0x89   :  { %108 = vst.msk [vmem:[#allocation0] sm:$0x7] %vm107_vm10, %v106_v51  }
  0x8e   :  { %v117_v59 = vpop.permute.xlu0 %116   ;;  %v128_v60 = vpop.permute.xlu1 %127  }
  0x8f   :  { %119 = vst.msk [vmem:[#allocation0] sm:$0x7] %vm118_vm11, %v117_v59  }
  0x90   :  { %130 = vst.msk [vmem:[#allocation0] sm:$0x7] %vm129_vm12, %v128_v60  }
  0x91   :  { %141 = vst.msk [vmem:[#allocation0] sm:$0x7] %vm140_vm13, %v139_v54  }
  0x96   :  { %v150_v61 = vpop.permute.xlu0 %149   ;;  %v161_v62 = vpop.permute.xlu1 %160  }
  0x97   :  { %152 = vst.msk [vmem:[#allocation0] sm:$0x7] %vm151_vm14, %v150_v61  }
  0x98   :  { %163 = vst.msk [vmem:[#allocation0] sm:$0x7] %vm162_vm15, %v161_v62  }
  0x99   :  { %174 = vst.msk [vmem:[#allocation0] sm:$0x7] %vm173_vm0, %v172_v57  }
  0xa0   :  { %v177_v63 = vld [vmem:[#allocation0] sm:$0xf] }
  0xa1   :  { %180 = vst [vmem:[%s368_s1] sm:$0xf] %v177_v63 }

// kernel: model_forward.1
= control target key start
LH: loop header
LB: loop body
LE: loop exit
PB: predicated region body
PF: predicated region fallthrough
CT: control target
= control target key end

     0   :  { %vm114_vm0 = vcmask 130048   ;;  %v898_v16 = vmov 16.0   ;;  %v899_v32 = vmov 0   ;;  %vm465_vm5 = vcmask 523264   ;;  %s1435_s1 = inlined_call_operand.vmem [shape: f32[128,16], index: 1, kind: input, shape index: {}]   ;;  %s1436_s4 = inlined_call_operand.vmem [shape: f32[64,1], index: 4, kind: input, shape index: {}]   ;;  %s1437_s2 = inlined_call_operand.vmem [shape: f32[64,128], index: 2, kind: input, shape index: {}]   ;;  %s1438_s6 = inlined_call_operand.vmem [shape: f32[64,1], index: 6, kind: input, shape index: {}]   ;;  %s1439_s3 = inlined_call_operand.vmem [shape: f32[64,16], index: 3, kind: input, shape index: {}]   ;;  %s1440_s11 = inlined_call_operand.vmem [shape: f32[32,1], index: 11, kind: input, shape index: {}]   ;;  %s1441_s13 = inlined_call_operand.vmem [shape: f32[32,1], index: 13, kind: input, shape index: {}]   ;;  %s1442_s15 = inlined_call_operand.vmem [shape: f32[8,1], index: 15, kind: input, shape index: {}]   ;;  %s1443_s5 = inlined_call_operand.vmem [shape: f32[64,64], index: 5, kind: input, shape index: {}]   ;;  %s1444_s0 = inlined_call_operand.vmem [shape: f32[16,128], index: 0, kind: input, shape index: {}]   ;;  %s1445_s7 = inlined_call_operand.vmem [shape: f32[17,64], index: 7, kind: input, shape index: {}]   ;;  %s1446_s8 = inlined_call_operand.vmem [shape: f32[16,16], index: 8, kind: input, shape index: {}]   ;;  %s1447_s9 = inlined_call_operand.vmem [shape: f32[3,128], index: 9, kind: input, shape index: {}]   ;;  %s1448_s17 = inlined_call_operand.vmem [shape: f32[17,16], index: 17, kind: output, shape index: {1}]   ;;  %s1449_s10 = inlined_call_operand.vmem [shape: f32[32,16], index: 10, kind: input, shape index: {}]   ;;  %s1450_s12 = inlined_call_operand.vmem [shape: f32[32,32], index: 12, kind: input, shape index: {}]   ;;  %s1451_s14 = inlined_call_operand.vmem [shape: f32[8,32], index: 14, kind: input, shape index: {}]   ;;  %s1452_s16 = inlined_call_operand.vmem [shape: f32[8,128], index: 16, kind: output, shape index: {0}]  }
   0x1   :  { %1455 = sst [smem:[#allocation2_spill]] %s1435_s1  ;;  %888 = vrcp.f32 %v898_v16  ;;  %883 = vset.pattern.permute.xlu1 %v899_v32  ;;  %882 = vset.pattern.permute.xlu0 %v899_v32  ;;  %vm581_vm9 = vcmask 122880   ;;  %vm758_vm13 = vcmask 261120  }
   0x2   :  { %1456 = sst [smem:[#allocation3_spill]] %s1436_s4  ;;  %884 = vset.pattern.permute.xlu2 %v899_v32 }
   0x3   :  { %s1457_s26 = sld [smem:[#allocation2_spill]] }
   0x4   :  { %s1458_s29 = sld [smem:[#allocation3_spill]] }
   0x7   :  { %v889_v29 = vpop.eup %888 }
   0x8   :  { %v65_v36 = vmul.f32 16.0, %v889_v29  ;;  %vm69_vm1 = vweird.f32 %v889_v29 }
   0x9   :  { %v993_v0 = vld [vmem:[%s1457_s26 + $0x78] sm:$0xff]  ;;  %v999_v1 = vld [vmem:[%s1457_s26 + $0x70] sm:$0xff]  ;;  %v1005_v2 = vld [vmem:[%s1457_s26 + $0x68] sm:$0xff] }
   0xa   :  { %304 = vmatpush.msra.mxu1 %v993_v0  ;;  %v1010_v3 = vld [vmem:[%s1457_s26 + $0x18] sm:$0xff]  ;;  %v1015_v4 = vld [vmem:[%s1457_s26] sm:$0xff]  ;;  %v1020_v5 = vld [vmem:[%s1457_s26 + $0x8] sm:$0xff]  ;;  %v66_v41 = vsub.f32 1.0, %v65_v36  ;;  %v140_v48 = vsel %vm114_vm0, %v1005_v2, 0.0  ;;  %v142_v50 = vsel %vm114_vm0, %v999_v1, 0.0 }
   0xb   :  { %v1026_v6 = vld [vmem:[%s1457_s26 + $0x10] sm:$0xff]  ;;  %v115_v7 = vsel %vm114_vm0, %v1015_v4, 0.0  ;;  %v116_v8 = vsel %vm114_vm0, %v1020_v5, 0.0  ;;  %v1035_v9 = vld [vmem:[%s1457_s26 + $0x60] sm:$0xff]  ;;  %v120_v13 = vsel %vm114_vm0, %v1010_v3, 0.0  ;;  %v1050_v14 = vld [vmem:[%s1457_s26 + $0x58] sm:$0xff] }
   0xc   :  { %305 = vmatpush.msra.mxu1 %v999_v1  ;;  %v1040_v10 = vld [vmem:[%s1457_s26 + $0x20] sm:$0xff]  ;;  %v117_v11 = vadd.f32 %v116_v8, %v115_v7  ;;  %v118_v12 = vsel %vm114_vm0, %v1026_v6, 0.0  ;;  %v1055_v15 = vld [vmem:[%s1457_s26 + $0x28] sm:$0xff]  ;;  %v1063_v19 = vld [vmem:[%s1457_s26 + $0x50] sm:$0xff]  ;;  %v136_v43 = vsel %vm114_vm0, %v1050_v14, 0.0  ;;  %v138_v45 = vsel %vm114_vm0, %v1035_v9, 0.0 }
   0xd   :  { %v122_v18 = vsel %vm114_vm0, %v1040_v10, 0.0  ;;  %v1068_v20 = vld [vmem:[%s1457_s26 + $0x30] sm:$0xff]  ;;  %v124_v22 = vsel %vm114_vm0, %v1055_v15, 0.0  ;;  %v1076_v23 = vld [vmem:[%s1457_s26 + $0x48] sm:$0xff]  ;;  %v1081_v24 = vld [vmem:[%s1457_s26 + $0x38] sm:$0xff]  ;;  %v134_v40 = vsel %vm114_vm0, %v1063_v19, 0.0  ;;  %v67_v46 = vmul.f32 %v889_v29, %v66_v41 }
   0xe   :  { %306 = vmatpush.msra.mxu1 %v1005_v2  ;;  %v119_v17 = vadd.f32 %v118_v12, %v117_v11  ;;  %v126_v26 = vsel %vm114_vm0, %v1068_v20, 0.0  ;;  %v350_v27 = vld [vmem:[%s1458_s29 + $0x28] sm:$0xff]  ;;  %v352_v28 = vld [vmem:[%s1458_s29 + $0x38] sm:$0xff]  ;;  %v1095_v30 = vld [vmem:[%s1457_s26 + $0x40] sm:$0xff]  ;;  %v128_v33 = vsel %vm114_vm0, %v1081_v24, 0.0  ;;  %v132_v38 = vsel %vm114_vm0, %v1076_v23, 0.0 }
   0xf   :  { %380 = vperm.xlu1 %883, %v350_v27   ;;  %390 = vperm.xlu0 %882, %v352_v28   ;;  %v130_v35 = vsel %vm114_vm0, %v1095_v30, 0.0  ;;  %v68_v51 = vadd.f32 %v889_v29, %v67_v46  ;;  %v144_v53 = vsel %vm114_vm0, %v993_v0, 0.0 }
  0x10   :  { %307 = vmatpush.msra.mxu1 %v1035_v9  ;;  %v121_v21 = vadd.f32 %v120_v13, %v119_v17 }
  0x11   :  { %v1124_v55 = vsel %vm69_vm1, %v889_v29, %v68_v51 }
  0x12   :  { %308 = vmatpush.msra.mxu1 %v1050_v14  ;;  %v123_v25 = vadd.f32 %v122_v18, %v121_v21 }
  0x14   :  { %309 = vmatpush.msra.mxu1 %v1063_v19  ;;  %v125_v31 = vadd.f32 %v124_v22, %v123_v25 }
  0x16   :  { %310 = vmatpush.msra.mxu1 %v1076_v23  ;;  %v127_v34 = vadd.f32 %v126_v26, %v125_v31 }
  0x18   :  { %311 = vmatpush.msra.mxu1 %v1095_v30  ;;  %v129_v37 = vadd.f32 %v128_v33, %v127_v34 }
  0x1a   :  { %312 = vmatpush.msra.mxu1 %v1081_v24  ;;  %v131_v39 = vadd.f32 %v130_v35, %v129_v37 }
  0x1c   :  { %313 = vmatpush.msra.mxu1 %v1068_v20  ;;  %v133_v42 = vadd.f32 %v132_v38, %v131_v39 }
  0x1e   :  { %314 = vmatpush.msra.mxu1 %v1055_v15  ;;  %v135_v44 = vadd.f32 %v134_v40, %v133_v42 }
  0x20   :  { %315 = vmatpush.msra.mxu1 %v1040_v10  ;;  %v137_v47 = vadd.f32 %v136_v43, %v135_v44 }
  0x22   :  { %316 = vmatpush.msra.mxu1 %v1010_v3  ;;  %v139_v49 = vadd.f32 %v138_v45, %v137_v47 }
  0x24   :  { %317 = vmatpush.msra.mxu1 %v1026_v6  ;;  %v141_v52 = vadd.f32 %v140_v48, %v139_v49 }
  0x26   :  { %318 = vmatpush.msra.mxu1 %v1020_v5  ;;  %v143_v54 = vadd.f32 %v142_v50, %v141_v52 }
  0x28   :  { %319 = vmatpush.msra.mxu1 %v1015_v4  ;;  %v145_v56 = vadd.f32 %v144_v53, %v143_v54 }
  0x2a   :  { %v146_v57 = vmul.f32 %v145_v56, %v1124_v55  ;;  %v351_v56 = vld [vmem:[%s1458_s29 + $0x30] sm:$0xff] }
  0x2b   :  { %385 = vperm.xlu0 %882, %v351_v56  }
  0x2c   :  { %v147_v58 = vsub.f32 %v1015_v4, %v146_v57  ;;  %v148_v59 = vsub.f32 %v1020_v5, %v146_v57  ;;  %v149_v60 = vsub.f32 %v1026_v6, %v146_v57  ;;  %277 = vmatpush.msra.mxu0 %v146_v57  ;;  %v150_v61 = vsub.f32 %v1010_v3, %v146_v57 }
  0x2d   :  { %v151_v8 = vsub.f32 %v1040_v10, %v146_v57  ;;  %v152_v11 = vsub.f32 %v1055_v15, %v146_v57  ;;  %v153_v5 = vsub.f32 %v1068_v20, %v146_v57  ;;  %v154_v3 = vsub.f32 %v1081_v24, %v146_v57 }
  0x2e   :  { %v163_v62 = vmul.f32 %v147_v58, %v147_v58  ;;  %v164_v63 = vmul.f32 %v148_v59, %v148_v59  ;;  %v165_v7 = vmul.f32 %v149_v60, %v149_v60  ;;  %v166_v6 = vmul.f32 %v150_v61, %v150_v61 }
  0x2f   :  { %v167_v17 = vmul.f32 %v151_v8, %v151_v8  ;;  %v168_v21 = vmul.f32 %v152_v11, %v152_v11  ;;  %v155_v22 = vsub.f32 %v1095_v30, %v146_v57  ;;  %v169_v10 = vmul.f32 %v153_v5, %v153_v5  ;;  %v225_v11 = vld [vmem:[%s1437_s2 + $0x10] sm:$0xff] }
  0x30   :  { %v179_v12 = vsel %vm114_vm0, %v163_v62, 0.0  ;;  %v180_v13 = vsel %vm114_vm0, %v164_v63, 0.0  ;;  %v182_v4 = vsel %vm114_vm0, %v165_v7, 0.0  ;;  %v184_v15 = vsel %vm114_vm0, %v166_v6, 0.0  ;;  %v224_v62 = vld [vmem:[%s1437_s2 + $0x8] sm:$0xff]  ;;  %v345_v63 = vld [vmem:[%s1458_s29] sm:$0xff] }
  0x31   :  { %v181_v16 = vadd.f32 %v180_v13, %v179_v12  ;;  %v186_v25 = vsel %vm114_vm0, %v167_v17, 0.0  ;;  %v156_v27 = vsub.f32 %v1076_v23, %v146_v57  ;;  %v170_v28 = vmul.f32 %v154_v3, %v154_v3  ;;  %v346_v7 = vld [vmem:[%s1458_s29 + $0x8] sm:$0xff]  ;;  %v423_v12 = vld [vmem:[%s1438_s6 + $0x30] sm:$0xff]  ;;  %v226_v6 = vld [vmem:[%s1437_s2 + $0x18] sm:$0xff] }
  0x32   :  { %v188_v29 = vsel %vm114_vm0, %v168_v21, 0.0  ;;  %v157_v31 = vsub.f32 %v1063_v19, %v146_v57  ;;  %v171_v32 = vmul.f32 %v155_v22, %v155_v22  ;;  %v190_v24 = vsel %vm114_vm0, %v169_v10, 0.0  ;;  %v231_v10 = vld [vmem:[%s1439_s3] sm:$0xff] }
  0x33   :  { %v183_v18 = vadd.f32 %v182_v4, %v181_v16  ;;  %v158_v30 = vsub.f32 %v1050_v14, %v146_v57  ;;  %v172_v34 = vmul.f32 %v156_v27, %v156_v27  ;;  %v192_v35 = vsel %vm114_vm0, %v170_v28, 0.0  ;;  %360 = vperm.xlu0 %882, %v346_v7   ;;  %v417_v27 = vld [vmem:[%s1438_s6] sm:$0xff]  ;;  %v232_v28 = vld [vmem:[%s1439_s3 + $0x8] sm:$0xff] }
  0x34   :  { %v159_v37 = vsub.f32 %v1035_v9, %v146_v57  ;;  %v173_v38 = vmul.f32 %v157_v31, %v157_v31  ;;  %v194_v23 = vsel %vm114_vm0, %v171_v32, 0.0  ;;  %v160_v40 = vsub.f32 %v1005_v2, %v146_v57  ;;  %v347_v31 = vld [vmem:[%s1458_s29 + $0x10] sm:$0xff]  ;;  %v662_v32 = vld [vmem:[%s1440_s11 + $0x8] sm:$0xff] }
  0x35   :  { %v185_v26 = vadd.f32 %v184_v15, %v183_v18  ;;  %v174_v41 = vmul.f32 %v158_v30, %v158_v30  ;;  %v196_v19 = vsel %vm114_vm0, %v172_v34, 0.0  ;;  %v161_v43 = vsub.f32 %v999_v1, %v146_v57  ;;  %v223_v1 = vld [vmem:[%s1437_s2] sm:$0xff]  ;;  %v420_v18 = vld [vmem:[%s1438_s6 + $0x18] sm:$0xff] }
  0x36   :  { %v175_v44 = vmul.f32 %v159_v37, %v159_v37  ;;  %v198_v14 = vsel %vm114_vm0, %v173_v38, 0.0  ;;  %v162_v46 = vsub.f32 %v993_v0, %v146_v57  ;;  %v176_v47 = vmul.f32 %v160_v40, %v160_v40  ;;  %320 = vmatmul.f32.vlgmr.msra.gmra.mxu1 %v223_v1  ;;  %v349_v0 = vld [vmem:[%s1458_s29 + $0x20] sm:$0xff]  ;;  %v664_v30 = vld [vmem:[%s1440_s11 + $0x18] sm:$0xff] }
  0x37   :  { %v187_v20 = vadd.f32 %v186_v25, %v185_v26  ;;  %v200_v9 = vsel %vm114_vm0, %v174_v41, 0.0  ;;  %v177_v49 = vmul.f32 %v161_v43, %v161_v43  ;;  %375 = vperm.xlu1 %883, %v349_v0   ;;  %v227_v15 = vld [vmem:[%s1437_s2 + $0x20] sm:$0xff]  ;;  %v422_v25 = vld [vmem:[%s1438_s6 + $0x28] sm:$0xff]  ;;  %v348_v26 = vld [vmem:[%s1458_s29 + $0x18] sm:$0xff] }
  0x38   :  { %v202_v50 = vsel %vm114_vm0, %v175_v44, 0.0  ;;  %v178_v51 = vmul.f32 %v162_v46, %v162_v46  ;;  %v204_v52 = vsel %vm114_vm0, %v176_v47, 0.0  ;;  %370 = vperm.xlu2 %884, %v348_v26   ;;  %v424_v34 = vld [vmem:[%s1438_s6 + $0x38] sm:$0xff]  ;;  %v661_v38 = vld [vmem:[%s1440_s11] sm:$0xff]  ;;  %v735_v41 = vld [vmem:[%s1441_s13 + $0x8] sm:$0xff] }
  0x39   :  { %v189_v33 = vadd.f32 %v188_v29, %v187_v20  ;;  %v206_v54 = vsel %vm114_vm0, %v177_v49, 0.0  ;;  %v228_v29 = vld [vmem:[%s1437_s2 + $0x28] sm:$0xff]  ;;  %v419_v20 = vld [vmem:[%s1438_s6 + $0x10] sm:$0xff]  ;;  %v230_v37 = vld [vmem:[%s1437_s2 + $0x38] sm:$0xff] }
  0x3a   :  { %v208_v58 = vsel %vm114_vm0, %v178_v51, 0.0  ;;  %v235_v40 = vld [vmem:[%s1439_s3 + $0x20] sm:$0xff]  ;;  %v663_v43 = vld [vmem:[%s1440_s11 + $0x10] sm:$0xff] }
  0x3b   :  { %v191_v36 = vadd.f32 %v190_v24, %v189_v33  ;;  %457 = vperm.xlu0 %882, %v423_v12   ;;  %v233_v24 = vld [vmem:[%s1439_s3 + $0x10] sm:$0xff]  ;;  %v734_v46 = vld [vmem:[%s1441_s13] sm:$0xff] }
  0x3c   :  { %v229_v33 = vld [vmem:[%s1437_s2 + $0x30] sm:$0xff] }
  0x3d   :  { %v193_v39 = vadd.f32 %v192_v35, %v191_v36  ;;  %v736_v35 = vld [vmem:[%s1441_s13 + $0x10] sm:$0xff]  ;;  %v234_v36 = vld [vmem:[%s1439_s3 + $0x18] sm:$0xff] }
  0x3e   :  { %323 = vmatmul.f32.gmra.mxu1 %v224_v62  ;;  %v237_v44 = vld [vmem:[%s1439_s3 + $0x30] sm:$0xff] }
  0x3f   :  { %v195_v42 = vadd.f32 %v194_v23, %v193_v39  ;;  %355 = vperm.xlu1 %883, %v345_v63   ;;  %v421_v23 = vld [vmem:[%s1438_s6 + $0x20] sm:$0xff] }
  0x40   :  { %365 = vperm.xlu2 %884, %v347_v31   ;;  %v805_v39 = vld [vmem:[%s1442_s15] sm:$0xff] }
  0x41   :  { %v197_v45 = vadd.f32 %v196_v19, %v195_v42  ;;  %v418_v19 = vld [vmem:[%s1438_s6 + $0x8] sm:$0xff] }
  0x42   :  { %v236_v42 = vld [vmem:[%s1439_s3 + $0x28] sm:$0xff] }
  0x43   :  { %v199_v48 = vadd.f32 %v198_v14, %v197_v45  ;;  %442 = vperm.xlu0 %882, %v420_v18   ;;  %v737_v14 = vld [vmem:[%s1441_s13 + $0x18] sm:$0xff] }
  0x44   :  { %v238_v45 = vld [vmem:[%s1439_s3 + $0x38] sm:$0xff] }
  0x45   :  { %v201_v2 = vadd.f32 %v200_v9, %v199_v48 }
  0x46   :  { %326 = vmatmul.f32.gmra.mxu1 %v225_v11 }
  0x47   :  { %v203_v53 = vadd.f32 %v202_v50, %v201_v2  ;;  %452 = vperm.xlu1 %883, %v422_v25  }
  0x48   :  { %462 = vperm.xlu2 %884, %v424_v34  }
  0x49   :  { %v205_v57 = vadd.f32 %v204_v52, %v203_v53 }
  0x4b   :  { %v207_v59 = vadd.f32 %v206_v54, %v205_v57  ;;  %427 = vperm.xlu0 %882, %v417_v27  }
  0x4d   :  { %v209_v60 = vadd.f32 %v208_v58, %v207_v59 }
  0x4e   :  { %329 = vmatmul.f32.gmra.mxu1 %v226_v6 }
  0x4f   :  { %v210_v61 = vmul.f32 %v209_v60, %v1124_v55  ;;  %437 = vperm.xlu1 %883, %v419_v20  }
  0x50   :  { %447 = vperm.xlu2 %884, %v421_v23   ;;  %v413_v23 = vld [vmem:[%s1443_s5 + $0x20] sm:$0xff] }
  0x51   :  { %v211_v8 = vadd.f32 1e-05, %v210_v61 }
  0x53   :  { %890 = vrsqrt.f32 %v211_v8  ;;  %vm218_vm2 = vweird.f32 %v211_v8  ;;  %672 = vperm.xlu0 %882, %v662_v32  }
  0x56   :  { %332 = vmatmul.f32.gmra.mxu1 %v227_v15 }
  0x57   :  { %682 = vperm.xlu1 %883, %v664_v30  }
  0x58   :  { %432 = vperm.xlu2 %884, %v418_v19  }
  0x59   :  { %v891_v13 = vpop.eup %890 }
  0x5a   :  { %v213_v4 = vmul.f32 %v891_v13, %v211_v8  ;;  %vm219_vm3 = vweird.f32 %v891_v13 }
  0x5b   :  { %vm220_vm4 = vmor %vm218_vm2, %vm219_vm3  ;;  %750 = vperm.xlu0 %882, %v736_v35   ;;  %v409_v35 = vld [vmem:[%s1443_s5] sm:$0xff] }
  0x5c   :  { %v214_v16 = vmul.f32 %v891_v13, %v213_v4 }
  0x5e   :  { %v215_v5 = vmul.f32 0.5, %v214_v16  ;;  %335 = vmatmul.f32.gmra.mxu1 %v228_v29 }
  0x5f   :  { %667 = vperm.xlu1 %883, %v661_v38   ;;  %v412_v38 = vld [vmem:[%s1443_s5 + $0x18] sm:$0xff] }
  0x60   :  { %v216_v17 = vsub.f32 1.5, %v215_v5  ;;  %677 = vperm.xlu2 %884, %v663_v43   ;;  %v56_v43 = vld [vmem:[%s1444_s0 + $0x8] sm:$0xff] }
  0x62   :  { %v217_v3 = vmul.f32 %v891_v13, %v216_v17 }
  0x63   :  { %808 = vperm.xlu0 %882, %v805_v39   ;;  %v414_v39 = vld [vmem:[%s1443_s5 + $0x28] sm:$0xff] }
  0x64   :  { %v221_v21 = vsel %vm220_vm4, %v891_v13, %v217_v3 }
  0x65   :  { %v222_v22 = vmul.f32 %v221_v21, %v211_v8 }
  0x66   :  { %338 = vmatmul.f32.gmra.mxu1 %v229_v33 }
  0x67   :  { %278 = vmatpush.msra.mxu0 %v222_v22  ;;  %745 = vperm.xlu1 %883, %v735_v41   ;;  %v416_v41 = vld [vmem:[%s1443_s5 + $0x38] sm:$0xff] }
  0x68   :  { %850 = vmatmul.msk.f32.vlgmr.msra.gmra.mxu0 %vm114_vm0, %v231_v10  ;;  %755 = vperm.xlu2 %884, %v737_v14  }
  0x6e   :  { %341 = vmatmul.f32.gmra.mxu1 %v230_v37  ;;  %v411_v37 = vld [vmem:[%s1443_s5 + $0x10] sm:$0xff] }
  0x70   :  { %851 = vmatmul.msk.f32.gmra.mxu0 %vm114_vm0, %v232_v28  ;;  %740 = vperm.xlu2 %884, %v734_v46  }
  0x78   :  { %852 = vmatmul.msk.f32.gmra.mxu0 %vm114_vm0, %v233_v24 }
  0x80   :  { %853 = vmatmul.msk.f32.gmra.mxu0 %vm114_vm0, %v234_v36  ;;  %v410_v36 = vld [vmem:[%s1443_s5 + $0x8] sm:$0xff] }
  0x81   :  { %v381_v58 = vpop.permute.xlu1 %380  ;;  %v391_v59 = vpop.permute.xlu0 %390 }
  0x88   :  { %854 = vmatmul.msk.f32.gmra.mxu0 %vm114_vm0, %v235_v40  ;;  %v415_v40 = vld [vmem:[%s1443_s5 + $0x30] sm:$0xff] }
  0x90   :  { %855 = vmatmul.msk.f32.gmra.mxu0 %vm114_vm0, %v236_v42  ;;  %v55_v42 = vld [vmem:[%s1444_s0] sm:$0xff] }
  0x92   :  { %v371_v63 = vpop.permute.xlu2 %370 }
  0x98   :  { %856 = vmatmul.msk.f32.gmra.mxu0 %vm114_vm0, %v237_v44  ;;  %v57_v44 = vadd.f32 %v56_v43, %v55_v42 }
  0x9a   :  { %v366_v26 = vpop.permute.xlu2 %365 }
  0x9d   :  { %v386_v13 = vpop.permute.xlu0 %385 }
  0xa0   :  { %857 = vmatmul.msk.f32.gmra.mxu0 %vm114_vm0, %v238_v45  ;;  %v58_v45 = vrot.slane %v57_v44, 4 }
  0xa2   :  { %v59_v46 = vadd.f32 %v58_v45, %v57_v44  ;;  %v583_v45 = vld [vmem:[%s1446_s8] sm:$0xff] }
  0xa5   :  { %v361_v20 = vpop.permute.xlu0 %360 }
  0xa9   :  { %v376_v12 = vpop.permute.xlu1 %375 }
  0xb1   :  { %v356_v29 = vpop.permute.xlu1 %355 }
  0xb3   :  { %v321_v47 = vpop.f32.mrf.mxu1 }
  0xbb   :  { %v324_v9 = vpop.f32.mrf.mxu1 }
  0xc3   :  { %v327_v50 = vpop.f32.mrf.mxu1 }
  0xcb   :  { %v330_v51 = vpop.f32.mrf.mxu1 }
  0xd3   :  { %v333_v1 = vpop.f32.mrf.mxu1 }
  0xdb   :  { %v336_v0 = vpop.f32.mrf.mxu1 }
  0xe3   :  { %v339_v57 = vpop.f32.mrf.mxu1 }
  0xe5   :  { %v280_v48 = vpop.f32.mrf.mxu0 }
  0xe6   :  { %v322_v49 = vadd.f32 %v321_v47, %v280_v48  ;;  %v60_v47 = vrot.slane %v59_v46, 2 }
  0xe8   :  { %v393_v24 = vadd.f32 %v356_v29, %v322_v49 }
  0xea   :  { %v401_v34 = vmax.f32 %v393_v24, 0.0 }
  0xeb   :  { %v342_v61 = vpop.f32.mrf.mxu1 }
  0xed   :  { %v283_v2 = vpop.f32.mrf.mxu0 }
  0xee   :  { %v325_v10 = vadd.f32 %v324_v9, %v283_v2  ;;  %v61_v9 = vadd.f32 %v60_v47, %v59_v46  ;;  %v584_v46 = vld [vmem:[%s1446_s8 + $0x8] sm:$0xff] }
  0xf0   :  { %v394_v32 = vadd.f32 %v361_v20, %v325_v10  ;;  %v62_v49 = vrot.slane %v61_v9, 1 }
  0xf2   :  { %v402_v30 = vmax.f32 %v394_v32, 0.0 }
  0xf5   :  { %v286_v52 = vpop.f32.mrf.mxu0 }
  0xf6   :  { %v328_v3 = vadd.f32 %v327_v50, %v286_v52  ;;  %v63_v50 = vadd.f32 %v62_v49, %v61_v9 }
  0xf8   :  { %v395_v28 = vadd.f32 %v366_v26, %v328_v3  ;;  %v1326_v2 = vmul.f32 %v1124_v55, %v63_v50 }
  0xfa   :  { %v403_v33 = vmax.f32 %v395_v28, 0.0  ;;  %v73_v52 = vsub.f32 %v56_v43, %v1326_v2 }
  0xfd   :  { %v289_v53 = vpop.f32.mrf.mxu0 }
  0xfe   :  { %v331_v6 = vadd.f32 %v330_v51, %v289_v53  ;;  %v1329_v51 = vsub.f32 %v55_v42, %v1326_v2  ;;  %v539_v42 = vld [vmem:[%s1445_s7] sm:$0xff] }
 0x100   :  { %v396_v25 = vadd.f32 %v371_v63, %v331_v6 }
 0x102   :  { %v404_v31 = vmax.f32 %v396_v25, 0.0 }
 0x105   :  { %v292_v54 = vpop.f32.mrf.mxu0 }
 0x106   :  { %v334_v4 = vadd.f32 %v333_v1, %v292_v54  ;;  %v74_v1 = vmul.f32 %v1329_v51, %v1329_v51  ;;  %v75_v54 = vmul.f32 %v73_v52, %v73_v52 }
 0x108   :  { %v397_v22 = vadd.f32 %v376_v12, %v334_v4  ;;  %v458_v12 = vpop.permute.xlu0 %457 }
 0x10a   :  { %v405_v27 = vmax.f32 %v397_v22, 0.0 }
 0x10d   :  { %v295_v56 = vpop.f32.mrf.mxu0 }
 0x10e   :  { %v337_v8 = vadd.f32 %v336_v0, %v295_v56  ;;  %v76_v0 = vadd.f32 %v75_v54, %v74_v1 }
 0x110   :  { %v398_v18 = vadd.f32 %v381_v58, %v337_v8  ;;  %v77_v56 = vrot.slane %v76_v0, 4  ;;  %v443_v10 = vpop.permute.xlu0 %442 }
 0x112   :  { %v406_v15 = vmax.f32 %v398_v18, 0.0 }
 0x115   :  { %v298_v60 = vpop.f32.mrf.mxu0 }
 0x116   :  { %v340_v62 = vadd.f32 %v339_v57, %v298_v60  ;;  %v78_v57 = vadd.f32 %v77_v56, %v76_v0 }
 0x118   :  { %v399_v5 = vadd.f32 %v386_v13, %v340_v62 }
 0x11a   :  { %v407_v21 = vmax.f32 %v399_v5, 0.0  ;;  %v453_v5 = vpop.permute.xlu1 %452 }
 0x11d   :  { %v301_v7 = vpop.f32.mrf.mxu0 }
 0x11e   :  { %v343_v11 = vadd.f32 %v342_v61, %v301_v7 }
 0x120   :  { %v400_v16 = vadd.f32 %v391_v59, %v343_v11  ;;  %v79_v59 = vrot.slane %v78_v57, 2  ;;  %v463_v11 = vpop.permute.xlu2 %462 }
 0x122   :  { %v408_v17 = vmax.f32 %v400_v16, 0.0  ;;  %v80_v60 = vadd.f32 %v79_v59, %v78_v57 }
 0x124   :  { %498 = vmatpush.msra.mxu2 %v408_v17  ;;  %v81_v61 = vrot.slane %v80_v60, 1 }
 0x126   :  { %499 = vmatpush.msra.mxu2 %v407_v21  ;;  %v82_v62 = vadd.f32 %v81_v61, %v80_v60 }
 0x128   :  { %500 = vmatpush.msra.mxu2 %v406_v15  ;;  %v83_v7 = vmul.f32 %v82_v62, %v1124_v55  ;;  %v448_v17 = vpop.permute.xlu2 %447 }
 0x12a   :  { %501 = vmatpush.msra.mxu2 %v405_v27  ;;  %v84_v8 = vadd.f32 1e-05, %v83_v7 }
 0x12c   :  { %502 = vmatpush.msra.mxu2 %v404_v31  ;;  %892 = vrsqrt.f32 %v84_v8  ;;  %vm91_vm6 = vweird.f32 %v84_v8 }
 0x12e   :  { %503 = vmatpush.msra.mxu2 %v403_v33  ;;  %v438_v33 = vpop.permute.xlu1 %437 }
 0x130   :  { %504 = vmatpush.msra.mxu2 %v402_v30 }
 0x132   :  { %505 = vmatpush.msra.mxu2 %v401_v34  ;;  %v893_v4 = vpop.eup %892 }
 0x133   :  { %858 = vmatmul.msk.f32.vlgmr.msra.gmra.mxu2 %vm465_vm5, %v409_v35  ;;  %v86_v16 = vmul.f32 %v893_v4, %v84_v8  ;;  %vm92_vm7 = vweird.f32 %v893_v4  ;;  %v433_v35 = vpop.permute.xlu2 %432 }
 0x134   :  { %vm93_vm8 = vmor %vm91_vm6, %vm92_vm7 }
 0x135   :  { %v87_v6 = vmul.f32 %v893_v4, %v86_v16 }
 0x137   :  { %v88_v3 = vmul.f32 0.5, %v87_v6 }
 0x139   :  { %v89_v15 = vsub.f32 1.5, %v88_v3 }
 0x13b   :  { %859 = vmatmul.msk.f32.gmra.mxu2 %vm465_vm5, %v410_v36  ;;  %v90_v27 = vmul.f32 %v893_v4, %v89_v15  ;;  %v885_v15 = vld [vmem:[%s1447_s9] ss:$0 sm:$0xff] }
 0x13d   :  { %v94_v20 = vsel %vm93_vm8, %v893_v4, %v90_v27 }
 0x13e   :  { %v1335_v24 = vmul.f32 %v94_v20, %v84_v8  ;;  %v97_v43 = vmul.f32 %v94_v20, %v73_v52  ;;  %v96_v44 = vmul.f32 %v94_v20, %v1329_v51 }
 0x143   :  { %860 = vmatmul.msk.f32.gmra.mxu2 %vm465_vm5, %v411_v37 }
 0x14b   :  { %861 = vmatmul.msk.f32.gmra.mxu2 %vm465_vm5, %v412_v38  ;;  %v428_v38 = vpop.permute.xlu0 %427 }
 0x153   :  { %862 = vmatmul.msk.f32.gmra.mxu2 %vm465_vm5, %v413_v23 }
 0x15b   :  { %863 = vmatmul.msk.f32.gmra.mxu2 %vm465_vm5, %v414_v39 }
 0x163   :  { %864 = vmatmul.msk.f32.gmra.mxu2 %vm465_vm5, %v415_v40 }
 0x16b   :  { %865 = vmatmul.msk.f32.gmra.mxu2 %vm465_vm5, %v416_v41 }
 0x1b6   :  { %v1317_v19 = vpop.f32.mrf.mxu2 }
 0x1b7   :  { %v508_v23 = vadd.f32 %v1317_v19, %v428_v38  ;;  %v540_v19 = vld [vmem:[%s1445_s7 + $0x8] sm:$0xff] }
 0x1b9   :  { %v531_v41 = vmax.f32 %v508_v23, 0.0  ;;  %v683_v23 = vpop.permute.xlu1 %682 }
 0x1be   :  { %v510_v14 = vpop.f32.mrf.mxu2 }
 0x1bf   :  { %v511_v36 = vadd.f32 %v510_v14, %v433_v35  ;;  %v541_v14 = vld [vmem:[%s1445_s7 + $0x10] sm:$0x1]  ;;  %v660_v35 = vld [vmem:[%s1449_s10 + $0x18] sm:$0xff] }
 0x1c1   :  { %v532_v40 = vmax.f32 %v511_v36, 0.0 }
 0x1c6   :  { %v513_v48 = vpop.f32.mrf.mxu2 }
 0x1c7   :  { %v514_v30 = vadd.f32 %v513_v48, %v438_v33  ;;  %v657_v33 = vld [vmem:[%s1449_s10] sm:$0xff] }
 0x1c9   :  { %v533_v39 = vmax.f32 %v514_v30, 0.0  ;;  %v658_v30 = vld [vmem:[%s1449_s10 + $0x8] sm:$0xff] }
 0x1ce   :  { %v516_v53 = vpop.f32.mrf.mxu2 }
 0x1cf   :  { %v517_v31 = vadd.f32 %v516_v53, %v443_v10 }
 0x1d1   :  { %v534_v37 = vmax.f32 %v517_v31, 0.0 }
 0x1d6   :  { %v519_v58 = vpop.f32.mrf.mxu2 }
 0x1d7   :  { %v520_v28 = vadd.f32 %v519_v58, %v448_v17 }
 0x1d9   :  { %v535_v34 = vmax.f32 %v520_v28, 0.0 }
 0x1de   :  { %v522_v63 = vpop.f32.mrf.mxu2 }
 0x1df   :  { %v523_v25 = vadd.f32 %v522_v63, %v453_v5 }
 0x1e1   :  { %v536_v32 = vmax.f32 %v523_v25, 0.0 }
 0x1e6   :  { %v525_v13 = vpop.f32.mrf.mxu2 }
 0x1e7   :  { %v526_v21 = vadd.f32 %v525_v13, %v458_v12 }
 0x1e9   :  { %v537_v29 = vmax.f32 %v526_v21, 0.0 }
 0x1ee   :  { %v528_v18 = vpop.f32.mrf.mxu2 }
 0x1ef   :  { %v529_v22 = vadd.f32 %v528_v18, %v463_v11 }
 0x1f1   :  { %v538_v26 = vmax.f32 %v529_v22, 0.0 }
 0x1f3   :  { %559 = vmatpush.msra.mxu3 %v538_v26 }
 0x1f5   :  { %560 = vmatpush.msra.mxu3 %v537_v29 }
 0x1f7   :  { %561 = vmatpush.msra.mxu3 %v536_v32 }
 0x1f9   :  { %562 = vmatpush.msra.mxu3 %v535_v34  ;;  %v659_v34 = vld [vmem:[%s1449_s10 + $0x10] sm:$0xff] }
 0x1fb   :  { %563 = vmatpush.msra.mxu3 %v534_v37 }
 0x1fd   :  { %564 = vmatpush.msra.mxu3 %v533_v39  ;;  %v678_v39 = vpop.permute.xlu2 %677 }
 0x1ff   :  { %565 = vmatpush.msra.mxu3 %v532_v40 }
 0x201   :  { %566 = vmatpush.msra.mxu3 %v531_v41 }
 0x202   :  { %866 = vmatmul.msk.f32.vlgmr.msra.gmra.mxu3 %vm465_vm5, %v539_v42 }
 0x203   :  { %605 = vmatpush.msrb.mxu3 %v97_v43  ;;  %v673_v43 = vpop.permute.xlu0 %672 }
 0x205   :  { %606 = vmatpush.msrb.mxu3 %v96_v44 }
 0x20a   :  { %867 = vmatmul.msk.f32.gmra.mxu3 %vm465_vm5, %v540_v19 }
 0x212   :  { %868 = vmatmul.msk.f32.gmra.mxu3 %vm465_vm5, %v541_v14  ;;  %v668_v14 = vpop.permute.xlu1 %667 }
 0x21a   :  { %869 = vmatmul.msk.f32.vlgmr.msrb.gmra.mxu3 %vm114_vm0, %v583_v45 }
 0x222   :  { %870 = vmatmul.msk.f32.gmra.mxu3 %vm114_vm0, %v584_v46 }
 0x285   :  { %v568_v47 = vpop.f32.mrf.mxu3 }
 0x286   :  { %577 = vst.msk [vmem:[%s1448_s17] sm:$0xff] %vm114_vm0, %v568_v47 }
 0x28d   :  { %v571_v9 = vpop.f32.mrf.mxu3 }
 0x28e   :  { %578 = vst.msk [vmem:[%s1448_s17 + $0x8] sm:$0xff] %vm114_vm0, %v571_v9 }
 0x295   :  { %v574_v48 = vpop.f32.mrf.mxu3 }
 0x296   :  { %v579_v49 = vmul.f32 1.442695, %v574_v48  ;;  %v730_v48 = vld [vmem:[%s1450_s12] sm:$0xff] }
 0x298   :  { %894 = vpow2.f32 %v579_v49  ;;  %v731_v49 = vld [vmem:[%s1450_s12 + $0x8] sm:$0xff] }
 0x29d   :  { %v608_v50 = vpop.f32.mrf.mxu3 }
 0x29e   :  { %v895_v51 = vpop.eup %894 }
 0x29f   :  { %582 = vst.msk [vmem:[%s1448_s17 + $0x10] sm:$0x1] %vm581_vm9, %v895_v51  ;;  %v733_v51 = vld [vmem:[%s1450_s12 + $0x18] sm:$0xff] }
 0x2a5   :  { %v611_v52 = vpop.f32.mrf.mxu3 }
 0x2a6   :  { %v614_v53 = vadd.f32 %v611_v52, %v608_v50 }
 0x2a8   :  { %v615_v1 = vrot.slane %v614_v53, 4 }
 0x2aa   :  { %v616_v54 = vadd.f32 %v615_v1, %v614_v53 }
 0x2ac   :  { %v617_v0 = vrot.slane %v616_v54, 2 }
 0x2ae   :  { %v618_v56 = vadd.f32 %v617_v0, %v616_v54  ;;  %v756_v54 = vpop.permute.xlu2 %755  ;;  %v751_v0 = vpop.permute.xlu0 %750 }
 0x2b0   :  { %v619_v57 = vrot.slane %v618_v56, 1 }
 0x2b2   :  { %v620_v58 = vadd.f32 %v619_v57, %v618_v56 }
 0x2b4   :  { %v1371_v59 = vmul.f32 %v620_v58, %v1124_v55 }
 0x2b6   :  { %v622_v60 = vsub.f32 %v608_v50, %v1371_v59  ;;  %v623_v61 = vsub.f32 %v611_v52, %v1371_v59  ;;  %v732_v50 = vld [vmem:[%s1450_s12 + $0x10] sm:$0xff] }
 0x2b8   :  { %v624_v62 = vmul.f32 %v622_v60, %v622_v60  ;;  %v625_v63 = vmul.f32 %v623_v61, %v623_v61 }
 0x2ba   :  { %v626_v7 = vadd.f32 %v625_v63, %v624_v62  ;;  %v741_v63 = vpop.permute.xlu2 %740 }
 0x2bc   :  { %v627_v8 = vrot.slane %v626_v7, 4 }
 0x2be   :  { %v628_v11 = vadd.f32 %v627_v8, %v626_v7 }
 0x2c0   :  { %v629_v12 = vrot.slane %v628_v11, 2 }
 0x2c2   :  { %v630_v13 = vadd.f32 %v629_v12, %v628_v11 }
 0x2c4   :  { %v631_v4 = vrot.slane %v630_v13, 1 }
 0x2c6   :  { %v632_v16 = vadd.f32 %v631_v4, %v630_v13  ;;  %v804_v13 = vld [vmem:[%s1451_s14] sm:$0xff]  ;;  %v809_v4 = vpop.permute.xlu0 %808 }
 0x2c8   :  { %v633_v5 = vmul.f32 %v632_v16, %v1124_v55  ;;  %v1384_v55 = vld [vmem:[%s1447_s9 + $0x1] ss:$0 sm:$0xff] }
 0x2ca   :  { %v634_v6 = vadd.f32 1e-05, %v633_v5 }
 0x2cc   :  { %896 = vrsqrt.f32 %v634_v6  ;;  %vm641_vm11 = vweird.f32 %v634_v6 }
 0x2d2   :  { %v897_v17 = vpop.eup %896 }
 0x2d3   :  { %v636_v18 = vmul.f32 %v897_v17, %v634_v6  ;;  %vm642_vm10 = vweird.f32 %v897_v17 }
 0x2d4   :  { %vm643_vm12 = vmor %vm641_vm11, %vm642_vm10 }
 0x2d5   :  { %v637_v3 = vmul.f32 %v897_v17, %v636_v18 }
 0x2d7   :  { %v638_v21 = vmul.f32 0.5, %v637_v3 }
 0x2d9   :  { %v639_v22 = vsub.f32 1.5, %v638_v21 }
 0x2db   :  { %v640_v10 = vmul.f32 %v897_v17, %v639_v22 }
 0x2dd   :  { %v644_v25 = vsel %vm643_vm12, %v897_v17, %v640_v10 }
 0x2de   :  { %v1379_v26 = vmul.f32 %v644_v25, %v634_v6  ;;  %v650_v27 = vmul.f32 %v644_v25, %v623_v61  ;;  %v649_v28 = vmul.f32 %v644_v25, %v622_v60  ;;  %v746_v60 = vpop.permute.xlu1 %745  ;;  %v887_v6 = vld [vmem:[%s1447_s9 + $0x2] ss:$0 sm:$0xff] }
 0x2e0   :  { %v653_v29 = vmul.f32 %v885_v15, %v650_v27  ;;  %v652_v20 = vmul.f32 %v885_v15, %v649_v28 }
 0x2e2   :  { %v656_v31 = vadd.f32 %v1384_v55, %v653_v29  ;;  %v655_v32 = vadd.f32 %v1384_v55, %v652_v20 }
 0x2e4   :  { %711 = vmatpush.msra.mxu3 %v656_v31 }
 0x2e6   :  { %712 = vmatpush.msra.mxu3 %v655_v32 }
 0x2e7   :  { %871 = vmatmul.msk.f32.vlgmr.msra.gmra.mxu3 %vm114_vm0, %v657_v33 }
 0x2ef   :  { %872 = vmatmul.msk.f32.gmra.mxu3 %vm114_vm0, %v658_v30 }
 0x2f7   :  { %873 = vmatmul.msk.f32.gmra.mxu3 %vm114_vm0, %v659_v34 }
 0x2ff   :  { %874 = vmatmul.msk.f32.gmra.mxu3 %vm114_vm0, %v660_v35 }
 0x36a   :  { %v714_v36 = vpop.f32.mrf.mxu3 }
 0x36b   :  { %v715_v45 = vadd.f32 %v714_v36, %v668_v14 }
 0x36d   :  { %v726_v9 = vmax.f32 %v715_v45, 0.0 }
 0x372   :  { %v717_v37 = vpop.f32.mrf.mxu3 }
 0x373   :  { %v718_v44 = vadd.f32 %v717_v37, %v673_v43 }
 0x375   :  { %v727_v47 = vmax.f32 %v718_v44, 0.0 }
 0x37a   :  { %v720_v38 = vpop.f32.mrf.mxu3 }
 0x37b   :  { %v721_v41 = vadd.f32 %v720_v38, %v678_v39 }
 0x37d   :  { %v728_v46 = vmax.f32 %v721_v41, 0.0 }
 0x382   :  { %v723_v40 = vpop.f32.mrf.mxu3 }
 0x383   :  { %v724_v42 = vadd.f32 %v723_v40, %v683_v23 }
 0x385   :  { %v729_v19 = vmax.f32 %v724_v42, 0.0 }
 0x387   :  { %783 = vmatpush.msrb.mxu0 %v729_v19 }
 0x389   :  { %784 = vmatpush.msrb.mxu0 %v728_v46 }
 0x38b   :  { %785 = vmatpush.msrb.mxu0 %v727_v47 }
 0x38d   :  { %786 = vmatpush.msrb.mxu0 %v726_v9 }
 0x38e   :  { %875 = vmatmul.msk.f32.vlgmr.msrb.gmra.mxu0 %vm758_vm13, %v730_v48 }
 0x396   :  { %876 = vmatmul.msk.f32.gmra.mxu0 %vm758_vm13, %v731_v49 }
 0x39e   :  { %877 = vmatmul.msk.f32.gmra.mxu0 %vm758_vm13, %v732_v50 }
 0x3a6   :  { %878 = vmatmul.msk.f32.gmra.mxu0 %vm758_vm13, %v733_v51 }
 0x40b   :  { %v788_v52 = vpop.f32.mrf.mxu0 }
 0x40c   :  { %v789_v7 = vadd.f32 %v788_v52, %v741_v63 }
 0x40e   :  { %v800_v12 = vmax.f32 %v789_v7, 0.0 }
 0x413   :  { %v791_v53 = vpop.f32.mrf.mxu0 }
 0x414   :  { %v792_v61 = vadd.f32 %v791_v53, %v746_v60 }
 0x416   :  { %v801_v11 = vmax.f32 %v792_v61, 0.0 }
 0x41b   :  { %v794_v1 = vpop.f32.mrf.mxu0 }
 0x41c   :  { %v795_v57 = vadd.f32 %v794_v1, %v751_v0 }
 0x41e   :  { %v802_v8 = vmax.f32 %v795_v57, 0.0 }
 0x423   :  { %v797_v56 = vpop.f32.mrf.mxu0 }
 0x424   :  { %v798_v58 = vadd.f32 %v797_v56, %v756_v54 }
 0x426   :  { %v803_v62 = vmax.f32 %v798_v58, 0.0 }
 0x428   :  { %826 = vmatpush.msrb.mxu2 %v803_v62 }
 0x42a   :  { %827 = vmatpush.msrb.mxu2 %v802_v8 }
 0x42c   :  { %828 = vmatpush.msrb.mxu2 %v801_v11 }
 0x42e   :  { %829 = vmatpush.msrb.mxu2 %v800_v12 }
 0x42f   :  { %879 = vmatmul.msk.f32.vlgmr.msrb.gmra.mxu2 %vm758_vm13, %v804_v13 }
 0x4b2   :  { %v831_v16 = vpop.f32.mrf.mxu2 }
 0x4b3   :  { %v832_v5 = vadd.f32 %v831_v16, %v809_v4 }
 0x4b5   :  { %v834_v17 = vsub.f32 %v832_v5, %v1384_v55 }
 0x4b7   :  { %v836_v18 = vmul.f32 %v887_v6, %v834_v17 }
 0x4b9   :  { %v837_v3 = vmul.f32 %v836_v18, %v1379_v26 }
 0x4bb   :  { %v838_v21 = vadd.f32 %v837_v3, %v1371_v59 }
 0x4bd   :  { %v839_v22 = vmul.f32 %v838_v21, %v1335_v24 }
 0x4bf   :  { %v840_v10 = vadd.f32 %v839_v22, %v1326_v2 }
 0x4c1   :  { %841 = vst [vmem:[%s1452_s16] sm:$0xff] %v840_v10 }

</bundles_post_ra>
